<compile_context>
chip_gen: v6e
topology: v6e:2x2x1
jax: 0.10.0
libtpu: 0.0.40
codegen_flags: <defaults>
</compile_context>

<pallas_src>
from functools import partial

import jax
import jax.numpy as jnp
from jax.experimental import pallas as pl
from jax.experimental.pallas import tpu as pltpu


def _layernorm(z, g, b, eps=1e-5):
    mu = jnp.mean(z, axis=-1, keepdims=True)
    var = jnp.mean((z - mu) ** 2, axis=-1, keepdims=True)
    return (z - mu) * jax.lax.rsqrt(var + eps) * g + b


def _softmax_last(z):
    m = jnp.max(z, axis=-1, keepdims=True)
    e = jnp.exp(z - m)
    return e * pl.reciprocal(jnp.sum(e, axis=-1, keepdims=True), approx=True)


def _disc_kernel(num_heads,
                 x_ref,
                 wemb_ref, bemb_ref,
                 ln1g_ref, ln1b_ref,
                 wqkv_ref, bqkv_ref,
                 wo_ref, bo_ref,
                 ln2g_ref, ln2b_ref,
                 w1_ref, b1_ref, w2_ref, b2_ref,
                 wf0_ref, bf0_ref, wf1_ref, bf1_ref,
                 woutr_ref, bout_ref,
                 o_ref):
    Bt, S, Din = x_ref.shape
    R = Bt * S
    mdt = wqkv_ref.dtype          # MXU operand dtype (f32 or bf16); accumulation f32

    def mm(a, w_ref, b_ref):
        w = w_ref[...]
        return jnp.dot(a.astype(w.dtype), w,
                       preferred_element_type=jnp.float32) + b_ref[...]

    # ---- embedding on the flattened (Bt*S, Din) slab ----
    x = x_ref[...].reshape(R, Din)
    h = mm(x, wemb_ref, bemb_ref)                                   # (R, H) f32
    H = h.shape[-1]
    dh = H // num_heads
    scale = 1.0 / (dh ** 0.5)

    # ---- transformer encoder layer (norm_first=True, eval mode) ----
    y = _layernorm(h, ln1g_ref[...], ln1b_ref[...])
    qkv = mm(y, wqkv_ref, bqkv_ref)                                 # (R, 3H) fused
    q, k, v = qkv[:, :H], qkv[:, H:2 * H], qkv[:, 2 * H:]

    head_outs = []
    for hd in range(num_heads):                                     # static, nh small
        sl = slice(hd * dh, (hd + 1) * dh)
        qh = q[:, sl].reshape(Bt, S, dh).astype(mdt)
        kh = k[:, sl].reshape(Bt, S, dh).astype(mdt)
        vh = v[:, sl].reshape(Bt, S, dh).astype(mdt)
        s = jnp.einsum('bqd,bkd->bqk', qh, kh,
                       preferred_element_type=jnp.float32) * scale  # (Bt,S,S) f32
        p = _softmax_last(s)
        oh = jnp.einsum('bqk,bkd->bqd', p.astype(mdt), vh,
                        preferred_element_type=jnp.float32)         # (Bt,S,dh)
        head_outs.append(oh.reshape(R, dh))
    attn = jnp.concatenate(head_outs, axis=-1)                      # (R, H)
    h1 = h + mm(attn, wo_ref, bo_ref)

    z = _layernorm(h1, ln2g_ref[...], ln2b_ref[...])
    ff = jnp.maximum(mm(z, w1_ref, b1_ref), 0.0)
    h2 = h1 + mm(ff, w2_ref, b2_ref)

    # ---- fc stack + output head ----
    f = jnp.maximum(mm(h2, wf0_ref, bf0_ref), 0.0)
    f = jnp.maximum(mm(f, wf1_ref, bf1_ref), 0.0)                   # (R, F)
    Fd = f.shape[-1]
    # Width-1 head as VPU multiply + lane reduction -> lane-dense (Bt, S) store
    # instead of a masked (R, 1) column store.
    f3 = f.reshape(Bt, S, Fd)
    logit = jnp.sum(f3 * woutr_ref[...], axis=-1) + bout_ref[...]   # (Bt, S) f32
    o_ref[...] = jax.nn.sigmoid(logit)


_MXU_WEIGHTS = ('wemb', 'wqkv', 'wo', 'w1', 'w2', 'wf0', 'wf1')

_PARAM_ORDER = ['wemb', 'bemb', 'ln1g', 'ln1b',
                'wqkv', 'bqkv', 'wo', 'bo',
                'ln2g', 'ln2b',
                'w1', 'b1', 'w2', 'b2',
                'wf0', 'bf0', 'wf1', 'bf1',
                'woutr', 'bout']


def _pick_block_b(B, S, target_rows=512):
    """Whole samples per grid step; returns Bt == B or a multiple of 8 dividing B."""
    if B * S <= 2 * target_rows:
        return B
    bt = -(-target_rows // S)          # ceil(target_rows / S)
    bt = -(-bt // 8) * 8               # round up to a multiple of 8 (sublane layout)
    while bt < B:
        if B % bt == 0:
            return bt
        bt += 8
    return B


def transformer_discriminator(x, params, num_heads, *, block_b=None,
                              matmul_dtype=jnp.float32):
    B, S, Din = x.shape
    Bt = block_b if block_b is not None else _pick_block_b(B, S)
    assert B % Bt == 0 and (Bt == B or Bt % 8 == 0), "invalid batch block"

    # Wrapper-side weight prep: fuse QKV, present the output head as a row vector.
    p = dict(params)
    p['wqkv'] = jnp.concatenate([p.pop('wq'), p.pop('wk'), p.pop('wv')], axis=1)
    p['bqkv'] = jnp.concatenate([p.pop('bq'), p.pop('bk'), p.pop('bv')], axis=1)
    p['woutr'] = p.pop('wout').reshape(1, 1, -1)      # (1, 1, fc_dim), stays f32 (VPU)

    weights = [p[k].astype(matmul_dtype) if k in _MXU_WEIGHTS
               else p[k].astype(jnp.float32)
               for k in _PARAM_ORDER]

    def full_spec(a):
        # Small parameter arrays resident in VMEM, same block every grid step.
        return pl.BlockSpec(a.shape, lambda b, n=a.ndim: (0,) * n)

    in_specs = ([pl.BlockSpec((Bt, S, Din), lambda b: (b, 0, 0))]
                + [full_spec(w) for w in weights])
    out_specs = pl.BlockSpec((Bt, S), lambda b: (b, 0))

    out = pl.pallas_call(
        partial(_disc_kernel, num_heads),
        out_shape=jax.ShapeDtypeStruct((B, S), jnp.float32),
        grid_spec=pltpu.PrefetchScalarGridSpec(
            num_scalar_prefetch=0,
            grid=(B // Bt,),
            in_specs=in_specs,
            out_specs=out_specs),
        compiler_params=pltpu.CompilerParams(
            dimension_semantics=("parallel",)),
    )(x, *weights)
    return out[..., None]                              # (B, S, 1), matches the module


def init_params(key, input_dim, hidden_dim, fc_dim):
    """Deterministic synthetic params (PyTorch-Linear-style uniform init, pre-transposed)."""
    keys = jax.random.split(key, 16)

    def lin(k, fan_in, fan_out):
        kw, kb = jax.random.split(k)
        bound = 1.0 / (fan_in ** 0.5)
        w = jax.random.uniform(kw, (fan_in, fan_out), jnp.float32, -bound, bound)
        b = jax.random.uniform(kb, (1, fan_out), jnp.float32, -bound, bound)
        return w, b

    p = {}
    p['wemb'], p['bemb'] = lin(keys[0], input_dim, hidden_dim)
    p['ln1g'] = jnp.ones((1, hidden_dim), jnp.float32)
    p['ln1b'] = jnp.zeros((1, hidden_dim), jnp.float32)
    p['wq'], p['bq'] = lin(keys[1], hidden_dim, hidden_dim)
    p['wk'], p['bk'] = lin(keys[2], hidden_dim, hidden_dim)
    p['wv'], p['bv'] = lin(keys[3], hidden_dim, hidden_dim)
    p['wo'], p['bo'] = lin(keys[4], hidden_dim, hidden_dim)
    p['ln2g'] = jnp.ones((1, hidden_dim), jnp.float32)
    p['ln2b'] = jnp.zeros((1, hidden_dim), jnp.float32)
    p['w1'], p['b1'] = lin(keys[5], hidden_dim, hidden_dim)   # dim_feedforward = hidden_dim
    p['w2'], p['b2'] = lin(keys[6], hidden_dim, hidden_dim)
    p['wf0'], p['bf0'] = lin(keys[7], hidden_dim, fc_dim)
    p['wf1'], p['bf1'] = lin(keys[8], fc_dim, fc_dim)
    p['wout'], p['bout'] = lin(keys[9], fc_dim, 1)
    return p


def reference_forward(x, p, num_heads):
    """Pure-JAX reference mirroring nn.TransformerEncoderLayer(norm_first=True), eval mode."""
    h = x @ p['wemb'] + p['bemb']
    B, S, H = h.shape
    dh = H // num_heads
    y = _layernorm(h, p['ln1g'], p['ln1b'])
    q = (y @ p['wq'] + p['bq']).reshape(B, S, num_heads, dh).transpose(0, 2, 1, 3)
    k = (y @ p['wk'] + p['bk']).reshape(B, S, num_heads, dh).transpose(0, 2, 1, 3)
    v = (y @ p['wv'] + p['bv']).reshape(B, S, num_heads, dh).transpose(0, 2, 1, 3)
    s = jnp.einsum('bhqd,bhkd->bhqk', q, k) / (dh ** 0.5)
    a = jax.nn.softmax(s, axis=-1)
    o = jnp.einsum('bhqk,bhkd->bhqd', a, v).transpose(0, 2, 1, 3).reshape(B, S, H)
    h1 = h + (o @ p['wo'] + p['bo'])
    z = _layernorm(h1, p['ln2g'], p['ln2b'])
    ff = jax.nn.relu(z @ p['w1'] + p['b1']) @ p['w2'] + p['b2']
    h2 = h1 + ff
    f = jax.nn.relu(h2 @ p['wf0'] + p['bf0'])
    f = jax.nn.relu(f @ p['wf1'] + p['bf1'])
    return jax.nn.sigmoid(f @ p['wout'] + p['bout'])


if __name__ == "__main__":
    INPUT_DIM, HIDDEN_DIM, FC_DIM, NUM_HEADS = 16, 32, 32, 4
    key = jax.random.PRNGKey(0)
    kx1, kx2, kp = jax.random.split(key, 3)
    params = init_params(kp, INPUT_DIM, HIDDEN_DIM, FC_DIM)

    # 1) Small batch, f32 MXU path, whole batch folded into one grid step.
    B1, S1 = 2, 8
    x1 = jax.random.normal(kx1, (B1, S1, INPUT_DIM), jnp.float32)
    out1 = jax.block_until_ready(
        transformer_discriminator(x1, params, NUM_HEADS, matmul_dtype=jnp.float32))
    ref1 = reference_forward(x1, params, NUM_HEADS)
    assert out1.shape == (B1, S1, 1)
    assert jnp.allclose(out1, ref1, atol=5e-3, rtol=5e-3), "f32 mismatch vs reference"

    # 2) Larger batch, bf16 MXU operands, multi-step parallel grid (block_b=8).
    B2, S2 = 40, 8
    x2 = jax.random.normal(kx2, (B2, S2, INPUT_DIM), jnp.float32)
    out2 = jax.block_until_ready(
        transformer_discriminator(x2, params, NUM_HEADS, block_b=8,
                                  matmul_dtype=jnp.bfloat16))
    ref2 = reference_forward(x2, params, NUM_HEADS)
    assert out2.shape == (B2, S2, 1)
    assert jnp.allclose(out2, ref2, atol=3e-2, rtol=3e-2), "bf16 mismatch vs reference"

    # TODO(synk): dropout is identity (inference semantics); calc_gradient_penalty is an
    # autograd/training construct and is not part of the forward kernel.
    print("KERNEL_OK")
</pallas_src>

<mosaic_0001>
module attributes {stable_mosaic.version = 11 : i64} {
  func.func @_disc_kernel(%arg0: i32, %arg1: memref<2x8x16xf32, #tpu.memory_space<vmem>>, %arg2: memref<16x32xf32, #tpu.memory_space<vmem>>, %arg3: memref<1x32xf32, #tpu.memory_space<vmem>>, %arg4: memref<1x32xf32, #tpu.memory_space<vmem>>, %arg5: memref<1x32xf32, #tpu.memory_space<vmem>>, %arg6: memref<32x96xf32, #tpu.memory_space<vmem>>, %arg7: memref<1x96xf32, #tpu.memory_space<vmem>>, %arg8: memref<32x32xf32, #tpu.memory_space<vmem>>, %arg9: memref<1x32xf32, #tpu.memory_space<vmem>>, %arg10: memref<1x32xf32, #tpu.memory_space<vmem>>, %arg11: memref<1x32xf32, #tpu.memory_space<vmem>>, %arg12: memref<32x32xf32, #tpu.memory_space<vmem>>, %arg13: memref<1x32xf32, #tpu.memory_space<vmem>>, %arg14: memref<32x32xf32, #tpu.memory_space<vmem>>, %arg15: memref<1x32xf32, #tpu.memory_space<vmem>>, %arg16: memref<32x32xf32, #tpu.memory_space<vmem>>, %arg17: memref<1x32xf32, #tpu.memory_space<vmem>>, %arg18: memref<32x32xf32, #tpu.memory_space<vmem>>, %arg19: memref<1x32xf32, #tpu.memory_space<vmem>>, %arg20: memref<1x1x32xf32, #tpu.memory_space<vmem>>, %arg21: memref<1x1xf32, #tpu.memory_space<vmem>>, %arg22: memref<2x8xf32, #tpu.memory_space<vmem>>) attributes {dimension_semantics = [#tpu.dimension_semantics<parallel>], iteration_bounds = array<i64: 1>, scalar_prefetch = 0 : i64, scratch_operands = 0 : i64, tpu.core_type = #tpu.core_type<tc>, window_params = [{transform_indices = @transform_0, window_bounds = array<i64: 2, 8, 16>}, {pipeline_mode = #tpu.pipeline_mode<synchronous>, transform_indices = @transform_1, window_bounds = array<i64: 16, 32>}, {pipeline_mode = #tpu.pipeline_mode<synchronous>, transform_indices = @transform_2, window_bounds = array<i64: 1, 32>}, {pipeline_mode = #tpu.pipeline_mode<synchronous>, transform_indices = @transform_3, window_bounds = array<i64: 1, 32>}, {pipeline_mode = #tpu.pipeline_mode<synchronous>, transform_indices = @transform_4, window_bounds = array<i64: 1, 32>}, {pipeline_mode = #tpu.pipeline_mode<synchronous>, transform_indices = @transform_5, window_bounds = array<i64: 32, 96>}, {pipeline_mode = #tpu.pipeline_mode<synchronous>, transform_indices = @transform_6, window_bounds = array<i64: 1, 96>}, {pipeline_mode = #tpu.pipeline_mode<synchronous>, transform_indices = @transform_7, window_bounds = array<i64: 32, 32>}, {pipeline_mode = #tpu.pipeline_mode<synchronous>, transform_indices = @transform_8, window_bounds = array<i64: 1, 32>}, {pipeline_mode = #tpu.pipeline_mode<synchronous>, transform_indices = @transform_9, window_bounds = array<i64: 1, 32>}, {pipeline_mode = #tpu.pipeline_mode<synchronous>, transform_indices = @transform_10, window_bounds = array<i64: 1, 32>}, {pipeline_mode = #tpu.pipeline_mode<synchronous>, transform_indices = @transform_11, window_bounds = array<i64: 32, 32>}, {pipeline_mode = #tpu.pipeline_mode<synchronous>, transform_indices = @transform_12, window_bounds = array<i64: 1, 32>}, {pipeline_mode = #tpu.pipeline_mode<synchronous>, transform_indices = @transform_13, window_bounds = array<i64: 32, 32>}, {pipeline_mode = #tpu.pipeline_mode<synchronous>, transform_indices = @transform_14, window_bounds = array<i64: 1, 32>}, {pipeline_mode = #tpu.pipeline_mode<synchronous>, transform_indices = @transform_15, window_bounds = array<i64: 32, 32>}, {pipeline_mode = #tpu.pipeline_mode<synchronous>, transform_indices = @transform_16, window_bounds = array<i64: 1, 32>}, {pipeline_mode = #tpu.pipeline_mode<synchronous>, transform_indices = @transform_17, window_bounds = array<i64: 32, 32>}, {pipeline_mode = #tpu.pipeline_mode<synchronous>, transform_indices = @transform_18, window_bounds = array<i64: 1, 32>}, {pipeline_mode = #tpu.pipeline_mode<synchronous>, transform_indices = @transform_19, window_bounds = array<i64: 1, 1, 32>}, {pipeline_mode = #tpu.pipeline_mode<synchronous>, transform_indices = @transform_20, window_bounds = array<i64: 1, 1>}, {transform_indices = @transform_21, window_bounds = array<i64: 2, 8>}]} {
    %c0 = arith.constant 0 : index
    %c0_0 = arith.constant 0 : index
    %c0_1 = arith.constant 0 : index
    %0 = vector.load %arg1[%c0, %c0_0, %c0_1] : memref<2x8x16xf32, #tpu.memory_space<vmem>>, vector<2x8x16xf32>
    %1 = vector.shape_cast %0 : vector<2x8x16xf32> to vector<16x16xf32>
    %c0_2 = arith.constant 0 : index
    %c0_3 = arith.constant 0 : index
    %2 = vector.load %arg2[%c0_2, %c0_3] : memref<16x32xf32, #tpu.memory_space<vmem>>, vector<16x32xf32>
    %cst = arith.constant dense<0.000000e+00> : vector<16x32xf32>
    %3 = tpu.matmul %1, %2, %cst {dimension_numbers = #tpu.dot_dimension_numbers<[1], [0], [0], [1], [0, 0, 1, 1], [], []>} : vector<16x16xf32>, vector<16x32xf32>, vector<16x32xf32> -> vector<16x32xf32>
    %c0_4 = arith.constant 0 : index
    %c0_5 = arith.constant 0 : index
    %4 = vector.load %arg3[%c0_4, %c0_5] : memref<1x32xf32, #tpu.memory_space<vmem>>, vector<1x32xf32>
    %5 = vector.broadcast %4 : vector<1x32xf32> to vector<16x32xf32>
    %6 = arith.addf %3, %5 : vector<16x32xf32>
    %c0_6 = arith.constant 0 : index
    %c0_7 = arith.constant 0 : index
    %7 = vector.load %arg4[%c0_6, %c0_7] : memref<1x32xf32, #tpu.memory_space<vmem>>, vector<1x32xf32>
    %c0_8 = arith.constant 0 : index
    %c0_9 = arith.constant 0 : index
    %8 = vector.load %arg5[%c0_8, %c0_9] : memref<1x32xf32, #tpu.memory_space<vmem>>, vector<1x32xf32>
    %cst_10 = arith.constant dense<0.000000e+00> : vector<16xf32>
    %9 = vector.multi_reduction <add>, %6, %cst_10 [1] : vector<16x32xf32> to vector<16xf32>
    %10 = vector.shape_cast %9 : vector<16xf32> to vector<16x1xf32>
    %cst_11 = arith.constant 3.200000e+01 : f32
    %11 = vector.broadcast %cst_11 : f32 to vector<16x1xf32>
    %12 = arith.divf %10, %11 : vector<16x1xf32>
    %13 = vector.broadcast %12 : vector<16x1xf32> to vector<16x32xf32>
    %14 = arith.subf %6, %13 : vector<16x32xf32>
    %15 = arith.mulf %14, %14 : vector<16x32xf32>
    %cst_12 = arith.constant dense<0.000000e+00> : vector<16xf32>
    %16 = vector.multi_reduction <add>, %15, %cst_12 [1] : vector<16x32xf32> to vector<16xf32>
    %17 = vector.shape_cast %16 : vector<16xf32> to vector<16x1xf32>
    %cst_13 = arith.constant 3.200000e+01 : f32
    %18 = vector.broadcast %cst_13 : f32 to vector<16x1xf32>
    %19 = arith.divf %17, %18 : vector<16x1xf32>
    %20 = vector.broadcast %12 : vector<16x1xf32> to vector<16x32xf32>
    %21 = arith.subf %6, %20 : vector<16x32xf32>
    %cst_14 = arith.constant 9.99999974E-6 : f32
    %22 = vector.broadcast %cst_14 : f32 to vector<16x1xf32>
    %23 = arith.addf %19, %22 : vector<16x1xf32>
    %24 = math.rsqrt %23 : vector<16x1xf32>
    %25 = vector.broadcast %24 : vector<16x1xf32> to vector<16x32xf32>
    %26 = arith.mulf %21, %25 : vector<16x32xf32>
    %27 = vector.broadcast %7 : vector<1x32xf32> to vector<16x32xf32>
    %28 = arith.mulf %26, %27 : vector<16x32xf32>
    %29 = vector.broadcast %8 : vector<1x32xf32> to vector<16x32xf32>
    %30 = arith.addf %28, %29 : vector<16x32xf32>
    %c0_15 = arith.constant 0 : index
    %c0_16 = arith.constant 0 : index
    %31 = vector.load %arg6[%c0_15, %c0_16] : memref<32x96xf32, #tpu.memory_space<vmem>>, vector<32x96xf32>
    %cst_17 = arith.constant dense<0.000000e+00> : vector<16x96xf32>
    %32 = tpu.matmul %30, %31, %cst_17 {dimension_numbers = #tpu.dot_dimension_numbers<[1], [0], [0], [1], [0, 0, 1, 1], [], []>} : vector<16x32xf32>, vector<32x96xf32>, vector<16x96xf32> -> vector<16x96xf32>
    %c0_18 = arith.constant 0 : index
    %c0_19 = arith.constant 0 : index
    %33 = vector.load %arg7[%c0_18, %c0_19] : memref<1x96xf32, #tpu.memory_space<vmem>>, vector<1x96xf32>
    %34 = vector.broadcast %33 : vector<1x96xf32> to vector<16x96xf32>
    %35 = arith.addf %32, %34 : vector<16x96xf32>
    %36 = vector.extract_strided_slice %35 {offsets = [0, 0], sizes = [16, 32], strides = [1, 1]} : vector<16x96xf32> to vector<16x32xf32>
    %37 = vector.extract_strided_slice %35 {offsets = [0, 32], sizes = [16, 32], strides = [1, 1]} : vector<16x96xf32> to vector<16x32xf32>
    %38 = vector.extract_strided_slice %35 {offsets = [0, 64], sizes = [16, 32], strides = [1, 1]} : vector<16x96xf32> to vector<16x32xf32>
    %39 = vector.extract_strided_slice %36 {offsets = [0, 0], sizes = [16, 8], strides = [1, 1]} : vector<16x32xf32> to vector<16x8xf32>
    %40 = vector.shape_cast %39 : vector<16x8xf32> to vector<2x8x8xf32>
    %41 = vector.extract_strided_slice %37 {offsets = [0, 0], sizes = [16, 8], strides = [1, 1]} : vector<16x32xf32> to vector<16x8xf32>
    %42 = vector.shape_cast %41 : vector<16x8xf32> to vector<2x8x8xf32>
    %43 = vector.extract_strided_slice %38 {offsets = [0, 0], sizes = [16, 8], strides = [1, 1]} : vector<16x32xf32> to vector<16x8xf32>
    %44 = vector.shape_cast %43 : vector<16x8xf32> to vector<2x8x8xf32>
    "tpu.trace_start"() <{level = 10 : i32, message = "bqd,bkd->bqk"}> : () -> ()
    %cst_20 = arith.constant dense<0.000000e+00> : vector<2x8x8xf32>
    %45 = tpu.matmul %40, %42, %cst_20 {dimension_numbers = #tpu.dot_dimension_numbers<[2], [2], [1], [1], [0, 0, 0, 1, 1, 1], [0], [0]>} : vector<2x8x8xf32>, vector<2x8x8xf32>, vector<2x8x8xf32> -> vector<2x8x8xf32>
    "tpu.trace_stop"() : () -> ()
    %cst_21 = arith.constant 0.353553385 : f32
    %46 = vector.broadcast %cst_21 : f32 to vector<2x8x8xf32>
    %47 = arith.mulf %45, %46 : vector<2x8x8xf32>
    %cst_22 = arith.constant dense<0xFF800000> : vector<2x8xf32>
    %48 = vector.multi_reduction <maximumf>, %47, %cst_22 [2] : vector<2x8x8xf32> to vector<2x8xf32>
    %49 = vector.shape_cast %48 : vector<2x8xf32> to vector<2x8x1xf32>
    %50 = vector.broadcast %49 : vector<2x8x1xf32> to vector<2x8x8xf32>
    %51 = arith.subf %47, %50 : vector<2x8x8xf32>
    %52 = math.exp %51 : vector<2x8x8xf32>
    %cst_23 = arith.constant dense<0.000000e+00> : vector<2x8xf32>
    %53 = vector.multi_reduction <add>, %52, %cst_23 [2] : vector<2x8x8xf32> to vector<2x8xf32>
    %54 = vector.shape_cast %53 : vector<2x8xf32> to vector<2x8x1xf32>
    %55 = tpu.reciprocal %54 {approx = true} : vector<2x8x1xf32> -> vector<2x8x1xf32>
    %56 = vector.broadcast %55 : vector<2x8x1xf32> to vector<2x8x8xf32>
    %57 = arith.mulf %52, %56 : vector<2x8x8xf32>
    "tpu.trace_start"() <{level = 10 : i32, message = "bqk,bkd->bqd"}> : () -> ()
    %cst_24 = arith.constant dense<0.000000e+00> : vector<2x8x8xf32>
    %58 = tpu.matmul %57, %44, %cst_24 {dimension_numbers = #tpu.dot_dimension_numbers<[2], [1], [1], [2], [0, 0, 0, 1, 1, 2], [0], [0]>} : vector<2x8x8xf32>, vector<2x8x8xf32>, vector<2x8x8xf32> -> vector<2x8x8xf32>
    "tpu.trace_stop"() : () -> ()
    %59 = vector.shape_cast %58 : vector<2x8x8xf32> to vector<16x8xf32>
    %60 = vector.extract_strided_slice %36 {offsets = [0, 8], sizes = [16, 8], strides = [1, 1]} : vector<16x32xf32> to vector<16x8xf32>
    %61 = vector.shape_cast %60 : vector<16x8xf32> to vector<2x8x8xf32>
    %62 = vector.extract_strided_slice %37 {offsets = [0, 8], sizes = [16, 8], strides = [1, 1]} : vector<16x32xf32> to vector<16x8xf32>
    %63 = vector.shape_cast %62 : vector<16x8xf32> to vector<2x8x8xf32>
    %64 = vector.extract_strided_slice %38 {offsets = [0, 8], sizes = [16, 8], strides = [1, 1]} : vector<16x32xf32> to vector<16x8xf32>
    %65 = vector.shape_cast %64 : vector<16x8xf32> to vector<2x8x8xf32>
    "tpu.trace_start"() <{level = 10 : i32, message = "bqd,bkd->bqk"}> : () -> ()
    %cst_25 = arith.constant dense<0.000000e+00> : vector<2x8x8xf32>
    %66 = tpu.matmul %61, %63, %cst_25 {dimension_numbers = #tpu.dot_dimension_numbers<[2], [2], [1], [1], [0, 0, 0, 1, 1, 1], [0], [0]>} : vector<2x8x8xf32>, vector<2x8x8xf32>, vector<2x8x8xf32> -> vector<2x8x8xf32>
    "tpu.trace_stop"() : () -> ()
    %cst_26 = arith.constant 0.353553385 : f32
    %67 = vector.broadcast %cst_26 : f32 to vector<2x8x8xf32>
    %68 = arith.mulf %66, %67 : vector<2x8x8xf32>
    %cst_27 = arith.constant dense<0xFF800000> : vector<2x8xf32>
    %69 = vector.multi_reduction <maximumf>, %68, %cst_27 [2] : vector<2x8x8xf32> to vector<2x8xf32>
    %70 = vector.shape_cast %69 : vector<2x8xf32> to vector<2x8x1xf32>
    %71 = vector.broadcast %70 : vector<2x8x1xf32> to vector<2x8x8xf32>
    %72 = arith.subf %68, %71 : vector<2x8x8xf32>
    %73 = math.exp %72 : vector<2x8x8xf32>
    %cst_28 = arith.constant dense<0.000000e+00> : vector<2x8xf32>
    %74 = vector.multi_reduction <add>, %73, %cst_28 [2] : vector<2x8x8xf32> to vector<2x8xf32>
    %75 = vector.shape_cast %74 : vector<2x8xf32> to vector<2x8x1xf32>
    %76 = tpu.reciprocal %75 {approx = true} : vector<2x8x1xf32> -> vector<2x8x1xf32>
    %77 = vector.broadcast %76 : vector<2x8x1xf32> to vector<2x8x8xf32>
    %78 = arith.mulf %73, %77 : vector<2x8x8xf32>
    "tpu.trace_start"() <{level = 10 : i32, message = "bqk,bkd->bqd"}> : () -> ()
    %cst_29 = arith.constant dense<0.000000e+00> : vector<2x8x8xf32>
    %79 = tpu.matmul %78, %65, %cst_29 {dimension_numbers = #tpu.dot_dimension_numbers<[2], [1], [1], [2], [0, 0, 0, 1, 1, 2], [0], [0]>} : vector<2x8x8xf32>, vector<2x8x8xf32>, vector<2x8x8xf32> -> vector<2x8x8xf32>
    "tpu.trace_stop"() : () -> ()
    %80 = vector.shape_cast %79 : vector<2x8x8xf32> to vector<16x8xf32>
    %81 = vector.extract_strided_slice %36 {offsets = [0, 16], sizes = [16, 8], strides = [1, 1]} : vector<16x32xf32> to vector<16x8xf32>
    %82 = vector.shape_cast %81 : vector<16x8xf32> to vector<2x8x8xf32>
    %83 = vector.extract_strided_slice %37 {offsets = [0, 16], sizes = [16, 8], strides = [1, 1]} : vector<16x32xf32> to vector<16x8xf32>
    %84 = vector.shape_cast %83 : vector<16x8xf32> to vector<2x8x8xf32>
    %85 = vector.extract_strided_slice %38 {offsets = [0, 16], sizes = [16, 8], strides = [1, 1]} : vector<16x32xf32> to vector<16x8xf32>
    %86 = vector.shape_cast %85 : vector<16x8xf32> to vector<2x8x8xf32>
    "tpu.trace_start"() <{level = 10 : i32, message = "bqd,bkd->bqk"}> : () -> ()
    %cst_30 = arith.constant dense<0.000000e+00> : vector<2x8x8xf32>
    %87 = tpu.matmul %82, %84, %cst_30 {dimension_numbers = #tpu.dot_dimension_numbers<[2], [2], [1], [1], [0, 0, 0, 1, 1, 1], [0], [0]>} : vector<2x8x8xf32>, vector<2x8x8xf32>, vector<2x8x8xf32> -> vector<2x8x8xf32>
    "tpu.trace_stop"() : () -> ()
    %cst_31 = arith.constant 0.353553385 : f32
    %88 = vector.broadcast %cst_31 : f32 to vector<2x8x8xf32>
    %89 = arith.mulf %87, %88 : vector<2x8x8xf32>
    %cst_32 = arith.constant dense<0xFF800000> : vector<2x8xf32>
    %90 = vector.multi_reduction <maximumf>, %89, %cst_32 [2] : vector<2x8x8xf32> to vector<2x8xf32>
    %91 = vector.shape_cast %90 : vector<2x8xf32> to vector<2x8x1xf32>
    %92 = vector.broadcast %91 : vector<2x8x1xf32> to vector<2x8x8xf32>
    %93 = arith.subf %89, %92 : vector<2x8x8xf32>
    %94 = math.exp %93 : vector<2x8x8xf32>
    %cst_33 = arith.constant dense<0.000000e+00> : vector<2x8xf32>
    %95 = vector.multi_reduction <add>, %94, %cst_33 [2] : vector<2x8x8xf32> to vector<2x8xf32>
    %96 = vector.shape_cast %95 : vector<2x8xf32> to vector<2x8x1xf32>
    %97 = tpu.reciprocal %96 {approx = true} : vector<2x8x1xf32> -> vector<2x8x1xf32>
    %98 = vector.broadcast %97 : vector<2x8x1xf32> to vector<2x8x8xf32>
    %99 = arith.mulf %94, %98 : vector<2x8x8xf32>
    "tpu.trace_start"() <{level = 10 : i32, message = "bqk,bkd->bqd"}> : () -> ()
    %cst_34 = arith.constant dense<0.000000e+00> : vector<2x8x8xf32>
    %100 = tpu.matmul %99, %86, %cst_34 {dimension_numbers = #tpu.dot_dimension_numbers<[2], [1], [1], [2], [0, 0, 0, 1, 1, 2], [0], [0]>} : vector<2x8x8xf32>, vector<2x8x8xf32>, vector<2x8x8xf32> -> vector<2x8x8xf32>
    "tpu.trace_stop"() : () -> ()
    %101 = vector.shape_cast %100 : vector<2x8x8xf32> to vector<16x8xf32>
    %102 = vector.extract_strided_slice %36 {offsets = [0, 24], sizes = [16, 8], strides = [1, 1]} : vector<16x32xf32> to vector<16x8xf32>
    %103 = vector.shape_cast %102 : vector<16x8xf32> to vector<2x8x8xf32>
    %104 = vector.extract_strided_slice %37 {offsets = [0, 24], sizes = [16, 8], strides = [1, 1]} : vector<16x32xf32> to vector<16x8xf32>
    %105 = vector.shape_cast %104 : vector<16x8xf32> to vector<2x8x8xf32>
    %106 = vector.extract_strided_slice %38 {offsets = [0, 24], sizes = [16, 8], strides = [1, 1]} : vector<16x32xf32> to vector<16x8xf32>
    %107 = vector.shape_cast %106 : vector<16x8xf32> to vector<2x8x8xf32>
    "tpu.trace_start"() <{level = 10 : i32, message = "bqd,bkd->bqk"}> : () -> ()
    %cst_35 = arith.constant dense<0.000000e+00> : vector<2x8x8xf32>
    %108 = tpu.matmul %103, %105, %cst_35 {dimension_numbers = #tpu.dot_dimension_numbers<[2], [2], [1], [1], [0, 0, 0, 1, 1, 1], [0], [0]>} : vector<2x8x8xf32>, vector<2x8x8xf32>, vector<2x8x8xf32> -> vector<2x8x8xf32>
    "tpu.trace_stop"() : () -> ()
    %cst_36 = arith.constant 0.353553385 : f32
    %109 = vector.broadcast %cst_36 : f32 to vector<2x8x8xf32>
    %110 = arith.mulf %108, %109 : vector<2x8x8xf32>
    %cst_37 = arith.constant dense<0xFF800000> : vector<2x8xf32>
    %111 = vector.multi_reduction <maximumf>, %110, %cst_37 [2] : vector<2x8x8xf32> to vector<2x8xf32>
    %112 = vector.shape_cast %111 : vector<2x8xf32> to vector<2x8x1xf32>
    %113 = vector.broadcast %112 : vector<2x8x1xf32> to vector<2x8x8xf32>
    %114 = arith.subf %110, %113 : vector<2x8x8xf32>
    %115 = math.exp %114 : vector<2x8x8xf32>
    %cst_38 = arith.constant dense<0.000000e+00> : vector<2x8xf32>
    %116 = vector.multi_reduction <add>, %115, %cst_38 [2] : vector<2x8x8xf32> to vector<2x8xf32>
    %117 = vector.shape_cast %116 : vector<2x8xf32> to vector<2x8x1xf32>
    %118 = tpu.reciprocal %117 {approx = true} : vector<2x8x1xf32> -> vector<2x8x1xf32>
    %119 = vector.broadcast %118 : vector<2x8x1xf32> to vector<2x8x8xf32>
    %120 = arith.mulf %115, %119 : vector<2x8x8xf32>
    "tpu.trace_start"() <{level = 10 : i32, message = "bqk,bkd->bqd"}> : () -> ()
    %cst_39 = arith.constant dense<0.000000e+00> : vector<2x8x8xf32>
    %121 = tpu.matmul %120, %107, %cst_39 {dimension_numbers = #tpu.dot_dimension_numbers<[2], [1], [1], [2], [0, 0, 0, 1, 1, 2], [0], [0]>} : vector<2x8x8xf32>, vector<2x8x8xf32>, vector<2x8x8xf32> -> vector<2x8x8xf32>
    "tpu.trace_stop"() : () -> ()
    %122 = vector.shape_cast %121 : vector<2x8x8xf32> to vector<16x8xf32>
    %123 = tpu.concatenate %59, %80, %101, %122 in 1 : vector<16x8xf32>, vector<16x8xf32>, vector<16x8xf32>, vector<16x8xf32> -> vector<16x32xf32>
    %c0_40 = arith.constant 0 : index
    %c0_41 = arith.constant 0 : index
    %124 = vector.load %arg8[%c0_40, %c0_41] : memref<32x32xf32, #tpu.memory_space<vmem>>, vector<32x32xf32>
    %cst_42 = arith.constant dense<0.000000e+00> : vector<16x32xf32>
    %125 = tpu.matmul %123, %124, %cst_42 {dimension_numbers = #tpu.dot_dimension_numbers<[1], [0], [0], [1], [0, 0, 1, 1], [], []>} : vector<16x32xf32>, vector<32x32xf32>, vector<16x32xf32> -> vector<16x32xf32>
    %c0_43 = arith.constant 0 : index
    %c0_44 = arith.constant 0 : index
    %126 = vector.load %arg9[%c0_43, %c0_44] : memref<1x32xf32, #tpu.memory_space<vmem>>, vector<1x32xf32>
    %127 = vector.broadcast %126 : vector<1x32xf32> to vector<16x32xf32>
    %128 = arith.addf %125, %127 : vector<16x32xf32>
    %129 = arith.addf %6, %128 : vector<16x32xf32>
    %c0_45 = arith.constant 0 : index
    %c0_46 = arith.constant 0 : index
    %130 = vector.load %arg10[%c0_45, %c0_46] : memref<1x32xf32, #tpu.memory_space<vmem>>, vector<1x32xf32>
    %c0_47 = arith.constant 0 : index
    %c0_48 = arith.constant 0 : index
    %131 = vector.load %arg11[%c0_47, %c0_48] : memref<1x32xf32, #tpu.memory_space<vmem>>, vector<1x32xf32>
    %cst_49 = arith.constant dense<0.000000e+00> : vector<16xf32>
    %132 = vector.multi_reduction <add>, %129, %cst_49 [1] : vector<16x32xf32> to vector<16xf32>
    %133 = vector.shape_cast %132 : vector<16xf32> to vector<16x1xf32>
    %cst_50 = arith.constant 3.200000e+01 : f32
    %134 = vector.broadcast %cst_50 : f32 to vector<16x1xf32>
    %135 = arith.divf %133, %134 : vector<16x1xf32>
    %136 = vector.broadcast %135 : vector<16x1xf32> to vector<16x32xf32>
    %137 = arith.subf %129, %136 : vector<16x32xf32>
    %138 = arith.mulf %137, %137 : vector<16x32xf32>
    %cst_51 = arith.constant dense<0.000000e+00> : vector<16xf32>
    %139 = vector.multi_reduction <add>, %138, %cst_51 [1] : vector<16x32xf32> to vector<16xf32>
    %140 = vector.shape_cast %139 : vector<16xf32> to vector<16x1xf32>
    %cst_52 = arith.constant 3.200000e+01 : f32
    %141 = vector.broadcast %cst_52 : f32 to vector<16x1xf32>
    %142 = arith.divf %140, %141 : vector<16x1xf32>
    %143 = vector.broadcast %135 : vector<16x1xf32> to vector<16x32xf32>
    %144 = arith.subf %129, %143 : vector<16x32xf32>
    %cst_53 = arith.constant 9.99999974E-6 : f32
    %145 = vector.broadcast %cst_53 : f32 to vector<16x1xf32>
    %146 = arith.addf %142, %145 : vector<16x1xf32>
    %147 = math.rsqrt %146 : vector<16x1xf32>
    %148 = vector.broadcast %147 : vector<16x1xf32> to vector<16x32xf32>
    %149 = arith.mulf %144, %148 : vector<16x32xf32>
    %150 = vector.broadcast %130 : vector<1x32xf32> to vector<16x32xf32>
    %151 = arith.mulf %149, %150 : vector<16x32xf32>
    %152 = vector.broadcast %131 : vector<1x32xf32> to vector<16x32xf32>
    %153 = arith.addf %151, %152 : vector<16x32xf32>
    %c0_54 = arith.constant 0 : index
    %c0_55 = arith.constant 0 : index
    %154 = vector.load %arg12[%c0_54, %c0_55] : memref<32x32xf32, #tpu.memory_space<vmem>>, vector<32x32xf32>
    %cst_56 = arith.constant dense<0.000000e+00> : vector<16x32xf32>
    %155 = tpu.matmul %153, %154, %cst_56 {dimension_numbers = #tpu.dot_dimension_numbers<[1], [0], [0], [1], [0, 0, 1, 1], [], []>} : vector<16x32xf32>, vector<32x32xf32>, vector<16x32xf32> -> vector<16x32xf32>
    %c0_57 = arith.constant 0 : index
    %c0_58 = arith.constant 0 : index
    %156 = vector.load %arg13[%c0_57, %c0_58] : memref<1x32xf32, #tpu.memory_space<vmem>>, vector<1x32xf32>
    %157 = vector.broadcast %156 : vector<1x32xf32> to vector<16x32xf32>
    %158 = arith.addf %155, %157 : vector<16x32xf32>
    %cst_59 = arith.constant 0.000000e+00 : f32
    %159 = vector.broadcast %cst_59 : f32 to vector<16x32xf32>
    %160 = arith.maximumf %158, %159 : vector<16x32xf32>
    %c0_60 = arith.constant 0 : index
    %c0_61 = arith.constant 0 : index
    %161 = vector.load %arg14[%c0_60, %c0_61] : memref<32x32xf32, #tpu.memory_space<vmem>>, vector<32x32xf32>
    %cst_62 = arith.constant dense<0.000000e+00> : vector<16x32xf32>
    %162 = tpu.matmul %160, %161, %cst_62 {dimension_numbers = #tpu.dot_dimension_numbers<[1], [0], [0], [1], [0, 0, 1, 1], [], []>} : vector<16x32xf32>, vector<32x32xf32>, vector<16x32xf32> -> vector<16x32xf32>
    %c0_63 = arith.constant 0 : index
    %c0_64 = arith.constant 0 : index
    %163 = vector.load %arg15[%c0_63, %c0_64] : memref<1x32xf32, #tpu.memory_space<vmem>>, vector<1x32xf32>
    %164 = vector.broadcast %163 : vector<1x32xf32> to vector<16x32xf32>
    %165 = arith.addf %162, %164 : vector<16x32xf32>
    %166 = arith.addf %129, %165 : vector<16x32xf32>
    %c0_65 = arith.constant 0 : index
    %c0_66 = arith.constant 0 : index
    %167 = vector.load %arg16[%c0_65, %c0_66] : memref<32x32xf32, #tpu.memory_space<vmem>>, vector<32x32xf32>
    %cst_67 = arith.constant dense<0.000000e+00> : vector<16x32xf32>
    %168 = tpu.matmul %166, %167, %cst_67 {dimension_numbers = #tpu.dot_dimension_numbers<[1], [0], [0], [1], [0, 0, 1, 1], [], []>} : vector<16x32xf32>, vector<32x32xf32>, vector<16x32xf32> -> vector<16x32xf32>
    %c0_68 = arith.constant 0 : index
    %c0_69 = arith.constant 0 : index
    %169 = vector.load %arg17[%c0_68, %c0_69] : memref<1x32xf32, #tpu.memory_space<vmem>>, vector<1x32xf32>
    %170 = vector.broadcast %169 : vector<1x32xf32> to vector<16x32xf32>
    %171 = arith.addf %168, %170 : vector<16x32xf32>
    %cst_70 = arith.constant 0.000000e+00 : f32
    %172 = vector.broadcast %cst_70 : f32 to vector<16x32xf32>
    %173 = arith.maximumf %171, %172 : vector<16x32xf32>
    %c0_71 = arith.constant 0 : index
    %c0_72 = arith.constant 0 : index
    %174 = vector.load %arg18[%c0_71, %c0_72] : memref<32x32xf32, #tpu.memory_space<vmem>>, vector<32x32xf32>
    %cst_73 = arith.constant dense<0.000000e+00> : vector<16x32xf32>
    %175 = tpu.matmul %173, %174, %cst_73 {dimension_numbers = #tpu.dot_dimension_numbers<[1], [0], [0], [1], [0, 0, 1, 1], [], []>} : vector<16x32xf32>, vector<32x32xf32>, vector<16x32xf32> -> vector<16x32xf32>
    %c0_74 = arith.constant 0 : index
    %c0_75 = arith.constant 0 : index
    %176 = vector.load %arg19[%c0_74, %c0_75] : memref<1x32xf32, #tpu.memory_space<vmem>>, vector<1x32xf32>
    %177 = vector.broadcast %176 : vector<1x32xf32> to vector<16x32xf32>
    %178 = arith.addf %175, %177 : vector<16x32xf32>
    %cst_76 = arith.constant 0.000000e+00 : f32
    %179 = vector.broadcast %cst_76 : f32 to vector<16x32xf32>
    %180 = arith.maximumf %178, %179 : vector<16x32xf32>
    %181 = vector.shape_cast %180 : vector<16x32xf32> to vector<2x8x32xf32>
    %c0_77 = arith.constant 0 : index
    %c0_78 = arith.constant 0 : index
    %c0_79 = arith.constant 0 : index
    %182 = vector.load %arg20[%c0_77, %c0_78, %c0_79] : memref<1x1x32xf32, #tpu.memory_space<vmem>>, vector<1x1x32xf32>
    %183 = vector.broadcast %182 : vector<1x1x32xf32> to vector<2x8x32xf32>
    %184 = arith.mulf %181, %183 : vector<2x8x32xf32>
    %cst_80 = arith.constant dense<0.000000e+00> : vector<2x8xf32>
    %185 = vector.multi_reduction <add>, %184, %cst_80 [2] : vector<2x8x32xf32> to vector<2x8xf32>
    %c0_81 = arith.constant 0 : index
    %c0_82 = arith.constant 0 : index
    %186 = vector.load %arg21[%c0_81, %c0_82] : memref<1x1xf32, #tpu.memory_space<vmem>>, vector<1x1xf32>
    %187 = vector.broadcast %186 : vector<1x1xf32> to vector<2x8xf32>
    %188 = arith.addf %185, %187 : vector<2x8xf32>
    %189 = arith.negf %188 : vector<2x8xf32>
    %190 = math.exp %189 : vector<2x8xf32>
    %cst_83 = arith.constant 1.000000e+00 : f32
    %191 = vector.broadcast %cst_83 : f32 to vector<2x8xf32>
    %192 = arith.addf %191, %190 : vector<2x8xf32>
    %193 = arith.divf %191, %192 : vector<2x8xf32>
    %c0_84 = arith.constant 0 : index
    %c0_85 = arith.constant 0 : index
    %194 = vector.load %arg22[%c0_84, %c0_85] : memref<2x8xf32, #tpu.memory_space<vmem>>, vector<2x8xf32>
    tpu.vector_store %arg22[%c0_84, %c0_85], %193 {strides = array<i32>} : memref<2x8xf32, #tpu.memory_space<vmem>>, vector<2x8xf32>,
    return
  }
  func.func @transform_0(%arg0: i32) -> (i32, i32, i32) {
    %c0_i32 = arith.constant 0 : i32
    %c0_i32_0 = arith.constant 0 : i32
    %c0_i32_1 = arith.constant 0 : i32
    return %arg0, %c0_i32, %c0_i32_0 : i32, i32, i32
  }
  func.func @transform_1(%arg0: i32) -> (i32, i32) {
    %c0_i32 = arith.constant 0 : i32
    %c0_i32_0 = arith.constant 0 : i32
    %c0_i32_1 = arith.constant 0 : i32
    return %c0_i32, %c0_i32_0 : i32, i32
  }
  func.func @transform_2(%arg0: i32) -> (i32, i32) {
    %c0_i32 = arith.constant 0 : i32
    %c0_i32_0 = arith.constant 0 : i32
    %c0_i32_1 = arith.constant 0 : i32
    return %c0_i32, %c0_i32_0 : i32, i32
  }
  func.func @transform_3(%arg0: i32) -> (i32, i32) {
    %c0_i32 = arith.constant 0 : i32
    %c0_i32_0 = arith.constant 0 : i32
    %c0_i32_1 = arith.constant 0 : i32
    return %c0_i32, %c0_i32_0 : i32, i32
  }
  func.func @transform_4(%arg0: i32) -> (i32, i32) {
    %c0_i32 = arith.constant 0 : i32
    %c0_i32_0 = arith.constant 0 : i32
    %c0_i32_1 = arith.constant 0 : i32
    return %c0_i32, %c0_i32_0 : i32, i32
  }
  func.func @transform_5(%arg0: i32) -> (i32, i32) {
    %c0_i32 = arith.constant 0 : i32
    %c0_i32_0 = arith.constant 0 : i32
    %c0_i32_1 = arith.constant 0 : i32
    return %c0_i32, %c0_i32_0 : i32, i32
  }
  func.func @transform_6(%arg0: i32) -> (i32, i32) {
    %c0_i32 = arith.constant 0 : i32
    %c0_i32_0 = arith.constant 0 : i32
    %c0_i32_1 = arith.constant 0 : i32
    return %c0_i32, %c0_i32_0 : i32, i32
  }
  func.func @transform_7(%arg0: i32) -> (i32, i32) {
    %c0_i32 = arith.constant 0 : i32
    %c0_i32_0 = arith.constant 0 : i32
    %c0_i32_1 = arith.constant 0 : i32
    return %c0_i32, %c0_i32_0 : i32, i32
  }
  func.func @transform_8(%arg0: i32) -> (i32, i32) {
    %c0_i32 = arith.constant 0 : i32
    %c0_i32_0 = arith.constant 0 : i32
    %c0_i32_1 = arith.constant 0 : i32
    return %c0_i32, %c0_i32_0 : i32, i32
  }
  func.func @transform_9(%arg0: i32) -> (i32, i32) {
    %c0_i32 = arith.constant 0 : i32
    %c0_i32_0 = arith.constant 0 : i32
    %c0_i32_1 = arith.constant 0 : i32
    return %c0_i32, %c0_i32_0 : i32, i32
  }
  func.func @transform_10(%arg0: i32) -> (i32, i32) {
    %c0_i32 = arith.constant 0 : i32
    %c0_i32_0 = arith.constant 0 : i32
    %c0_i32_1 = arith.constant 0 : i32
    return %c0_i32, %c0_i32_0 : i32, i32
  }
  func.func @transform_11(%arg0: i32) -> (i32, i32) {
    %c0_i32 = arith.constant 0 : i32
    %c0_i32_0 = arith.constant 0 : i32
    %c0_i32_1 = arith.constant 0 : i32
    return %c0_i32, %c0_i32_0 : i32, i32
  }
  func.func @transform_12(%arg0: i32) -> (i32, i32) {
    %c0_i32 = arith.constant 0 : i32
    %c0_i32_0 = arith.constant 0 : i32
    %c0_i32_1 = arith.constant 0 : i32
    return %c0_i32, %c0_i32_0 : i32, i32
  }
  func.func @transform_13(%arg0: i32) -> (i32, i32) {
    %c0_i32 = arith.constant 0 : i32
    %c0_i32_0 = arith.constant 0 : i32
    %c0_i32_1 = arith.constant 0 : i32
    return %c0_i32, %c0_i32_0 : i32, i32
  }
  func.func @transform_14(%arg0: i32) -> (i32, i32) {
    %c0_i32 = arith.constant 0 : i32
    %c0_i32_0 = arith.constant 0 : i32
    %c0_i32_1 = arith.constant 0 : i32
    return %c0_i32, %c0_i32_0 : i32, i32
  }
  func.func @transform_15(%arg0: i32) -> (i32, i32) {
    %c0_i32 = arith.constant 0 : i32
    %c0_i32_0 = arith.constant 0 : i32
    %c0_i32_1 = arith.constant 0 : i32
    return %c0_i32, %c0_i32_0 : i32, i32
  }
  func.func @transform_16(%arg0: i32) -> (i32, i32) {
    %c0_i32 = arith.constant 0 : i32
    %c0_i32_0 = arith.constant 0 : i32
    %c0_i32_1 = arith.constant 0 : i32
    return %c0_i32, %c0_i32_0 : i32, i32
  }
  func.func @transform_17(%arg0: i32) -> (i32, i32) {
    %c0_i32 = arith.constant 0 : i32
    %c0_i32_0 = arith.constant 0 : i32
    %c0_i32_1 = arith.constant 0 : i32
    return %c0_i32, %c0_i32_0 : i32, i32
  }
  func.func @transform_18(%arg0: i32) -> (i32, i32) {
    %c0_i32 = arith.constant 0 : i32
    %c0_i32_0 = arith.constant 0 : i32
    %c0_i32_1 = arith.constant 0 : i32
    return %c0_i32, %c0_i32_0 : i32, i32
  }
  func.func @transform_19(%arg0: i32) -> (i32, i32, i32) {
    %c0_i32 = arith.constant 0 : i32
    %c0_i32_0 = arith.constant 0 : i32
    %c0_i32_1 = arith.constant 0 : i32
    %c0_i32_2 = arith.constant 0 : i32
    return %c0_i32, %c0_i32_0, %c0_i32_1 : i32, i32, i32
  }
  func.func @transform_20(%arg0: i32) -> (i32, i32) {
    %c0_i32 = arith.constant 0 : i32
    %c0_i32_0 = arith.constant 0 : i32
    %c0_i32_1 = arith.constant 0 : i32
    return %c0_i32, %c0_i32_0 : i32, i32
  }
  func.func @transform_21(%arg0: i32) -> (i32, i32) {
    %c0_i32 = arith.constant 0 : i32
    %c0_i32_0 = arith.constant 0 : i32
    return %arg0, %c0_i32 : i32, i32
  }
}

</mosaic_0001>

<bundles_post_ra>
// kernel: tpu_custom_call.1
= control target key start
LH: loop header
LB: loop body
LE: loop exit
PB: predicated region body
PF: predicated region fallthrough
CT: control target
= control target key end

     0   :  { %s3593_s0 = inlined_call_operand.hbm [shape: f32[2,8,16], index: 0, kind: input, shape index: {}]   ;;  %s3594_s1 = inlined_call_operand.hbm [shape: f32[16,32], index: 1, kind: input, shape index: {}]   ;;  %s3595_s2 = inlined_call_operand.vmem [shape: f32[1,32], index: 2, kind: input, shape index: {}]   ;;  %s3596_s3 = inlined_call_operand.hbm [shape: f32[1,32], index: 3, kind: input, shape index: {}]   ;;  %s3597_s4 = inlined_call_operand.hbm [shape: f32[1,32], index: 4, kind: input, shape index: {}]   ;;  %s3598_s5 = inlined_call_operand.hbm [shape: f32[32,96], index: 5, kind: input, shape index: {}]   ;;  %s3599_s6 = inlined_call_operand.hbm [shape: f32[1,96], index: 6, kind: input, shape index: {}]   ;;  %s3600_s7 = inlined_call_operand.hbm [shape: f32[32,32], index: 7, kind: input, shape index: {}]   ;;  %s3601_s8 = inlined_call_operand.hbm [shape: f32[1,32], index: 8, kind: input, shape index: {}]   ;;  %s3602_s9 = inlined_call_operand.hbm [shape: f32[1,32], index: 9, kind: input, shape index: {}]   ;;  %s3603_s10 = inlined_call_operand.hbm [shape: f32[1,32], index: 10, kind: input, shape index: {}]   ;;  %s3604_s11 = inlined_call_operand.hbm [shape: f32[32,32], index: 11, kind: input, shape index: {}]   ;;  %s3605_s12 = inlined_call_operand.hbm [shape: f32[1,32], index: 12, kind: input, shape index: {}]   ;;  %s3606_s13 = inlined_call_operand.hbm [shape: f32[32,32], index: 13, kind: input, shape index: {}]   ;;  %s3607_s14 = inlined_call_operand.hbm [shape: f32[1,32], index: 14, kind: input, shape index: {}]   ;;  %s3608_s15 = inlined_call_operand.hbm [shape: f32[32,32], index: 15, kind: input, shape index: {}]   ;;  %s3609_s16 = inlined_call_operand.hbm [shape: f32[1,32], index: 16, kind: input, shape index: {}]   ;;  %s3610_s17 = inlined_call_operand.vmem [shape: f32[32,32], index: 17, kind: input, shape index: {}]   ;;  %s3611_s18 = inlined_call_operand.vmem [shape: f32[1,32], index: 18, kind: input, shape index: {}]   ;;  %s3612_s19 = inlined_call_operand.vmem [shape: f32[1,1,32], index: 19, kind: input, shape index: {}]   ;;  %s3613_s20 = inlined_call_operand.<no memory space> [shape: f32[1,1], index: 20, kind: input, shape index: {}]   ;;  %s3614_s21 = inlined_call_operand.hbm [shape: f32[2,8], index: 21, kind: output, shape index: {}]  }
   0x1   :  { %3615 = sst [smem:[#allocation40_spill]] %s3593_s0  ;;  %v26_v0 = vstv %s3613_s20 }
   0x2   :  { %3616 = sst [smem:[#allocation41_spill]] %s3594_s1  ;;  %27 = vst [vmem:[#allocation2] sm:$0x1] %v26_v0 }
   0x3   :  { %3617 = sst [smem:[#allocation42_spill]] %s3595_s2 }
   0x4   :  { %3618 = sst [smem:[#allocation43_spill]] %s3596_s3 }
   0x5   :  { %3619 = sst [smem:[#allocation44_spill]] %s3597_s4 }
   0x6   :  { %3620 = sst [smem:[#allocation45_spill]] %s3598_s5 }
   0x7   :  { %28 = vsyncpa [#allocation4], 0 }
   0x8   :  { %29 = vsyncpa [#allocation7], 0 }
   0x9   :  { %30 = vsyncpa [#allocation10], 0 }
   0xa   :  { %31 = vsyncpa [#allocation13], 0 }
   0xb   :  { %32 = vsyncpa [#allocation16], 0 }
   0xc   :  { %33 = vsyncpa [#allocation19], 0 }
   0xd   :  { %34 = vsyncpa [#allocation22], 0 }
   0xe   :  { %35 = vsyncpa [#allocation25], 0 }
   0xf   :  { %36 = vsyncpa [#allocation28], 0 }
  0x10   :  { %37 = vsyncpa [#allocation5], 0  ;;  %s3174_s26 = smov [#allocation6]   ;;  %s3175_s3 = smov [#allocation9]  }
  0x11   :  { %s55_s27 = sshll.u32 %s3174_s26, 4  ;;  %s80_s28 = sshll.u32 %s3175_s3, 4  ;;  %s56_s27 = int_to_ptr.vmem [resolvable:$true] %s55_s27  ;;  %s81_s28 = int_to_ptr.vmem [resolvable:$true] %s80_s28 }
  0x12   :  { %s2822_s29 = scalar_lea.vmem %s56_s27, 256  ;;  %p2827_p1 = scmp.lt.s32.totalorder %s56_s27, %s56_s27 }
  0x13   :  { %p2823_p0 = scmp.ne.s32.totalorder %s56_s27, %s2822_s29  ;;  %p2828_p2 = scmp.lt.s32.totalorder %s2822_s29, %s2822_s29 }
  0x15   :  { %p2829_p3 = por %p2828_p2, %p2827_p1 }
  0x17   :  { %p2830_p4 = pnand %p2829_p3, %p2823_p0 }
  0x19   :  { %2833 = shalt.err (!%p2830_p4)
}
  0x1a   :  { %s3176_s20 = smov 128   ;;  %s3177_s0 = smov 8  }
  0x1b   :  { %s3621_s5 = sld [smem:[#allocation41_spill]]  ;;  %s2842_s22 = scalar_lea.vmem %s81_s28, 16 }
  0x1c   :  { %p2843_p5 = scmp.ne.s32.totalorder %s81_s28, %s2842_s22  ;;  %s2846_s23 = scalar_lea.vmem %s81_s28, 32 }
  0x1d   :  { %p2847_p6 = scmp.lt.s32.totalorder %s81_s28, %s81_s28  ;;  %p2848_p7 = scmp.lt.s32.totalorder %s2846_s23, %s2842_s22 }
  0x1f   :  { %p2849_p8 = por %p2848_p7, %p2847_p6 }
  0x21   :  { %61 = dma.hbm_to_vmem [thread:$0]  %s3621_s5, 256, %s56_s27, [#allocation7], %s3176_s20, %s3176_s20, %s3177_s0  }
  0x22   :  { %p2850_p9 = pnand %p2849_p8, %p2843_p5 }
  0x24   :  { %2853 = shalt.err (!%p2850_p9)
}
  0x25   :  { %s3622_s2 = sld [smem:[#allocation44_spill]]  ;;  %s3178_s25 = smov [#allocation12]  }
  0x26   :  { %s102_s26 = sshll.u32 %s3178_s25, 4  ;;  %s3179_s3 = smov [#allocation15]   ;;  %s103_s26 = int_to_ptr.vmem [resolvable:$true] %s102_s26 }
  0x27   :  { %s124_s29 = sshll.u32 %s3179_s3, 4  ;;  %s2862_s4 = scalar_lea.vmem %s103_s26, 16  ;;  %s125_s29 = int_to_ptr.vmem [resolvable:$true] %s124_s29 }
  0x28   :  { %p2863_p10 = scmp.ne.s32.totalorder %s103_s26, %s2862_s4  ;;  %s2866_s27 = scalar_lea.vmem %s103_s26, 32 }
  0x29   :  { %p2867_p11 = scmp.lt.s32.totalorder %s103_s26, %s103_s26  ;;  %p2868_p12 = scmp.lt.s32.totalorder %s2866_s27, %s2862_s4 }
  0x2b   :  { %83 = dma.hbm_to_vmem [thread:$0]  %s3622_s2, 16, %s81_s28, [#allocation10]  }
  0x2c   :  { %p2869_p13 = por %p2868_p12, %p2867_p11 }
  0x2e   :  { %p2870_p0 = pnand %p2869_p13, %p2863_p10 }
  0x30   :  { %2873 = shalt.err (!%p2870_p0)
}
  0x31   :  { %105 = dma.hbm_to_vmem [thread:$0]  %s3599_s6, 16, %s103_s26, [#allocation13]  }
  0x32   :  { %s2882_s22 = scalar_lea.vmem %s125_s29, 16  ;;  %s2886_s28 = scalar_lea.vmem %s125_s29, 32 }
  0x33   :  { %p2883_p1 = scmp.ne.s32.totalorder %s125_s29, %s2882_s22  ;;  %p2887_p2 = scmp.lt.s32.totalorder %s125_s29, %s125_s29 }
  0x34   :  { %p2888_p3 = scmp.lt.s32.totalorder %s2886_s28, %s2882_s22 }
  0x36   :  { %p2889_p4 = por %p2888_p3, %p2887_p2 }
  0x38   :  { %p2890_p5 = pnand %p2889_p4, %p2883_p1 }
  0x3a   :  { %2893 = shalt.err (!%p2890_p5)
}
  0x3b   :  { %127 = dma.hbm_to_vmem [thread:$0]  %s3601_s8, 16, %s125_s29, [#allocation16]  }
  0x3c   :  { %s3180_s24 = smov [#allocation18]   ;;  %s3181_s25 = smov [#allocation21]  }
  0x3d   :  { %s144_s2 = sshll.u32 %s3180_s24, 4  ;;  %s166_s3 = sshll.u32 %s3181_s25, 4  ;;  %s145_s2 = int_to_ptr.vmem [resolvable:$true] %s144_s2  ;;  %s167_s3 = int_to_ptr.vmem [resolvable:$true] %s166_s3 }
  0x3e   :  { %s2902_s4 = scalar_lea.vmem %s145_s2, 16  ;;  %s2906_s6 = scalar_lea.vmem %s145_s2, 32 }
  0x3f   :  { %p2903_p6 = scmp.ne.s32.totalorder %s145_s2, %s2902_s4  ;;  %p2907_p7 = scmp.lt.s32.totalorder %s145_s2, %s145_s2 }
  0x40   :  { %p2908_p8 = scmp.lt.s32.totalorder %s2906_s6, %s2902_s4 }
  0x42   :  { %p2909_p9 = por %p2908_p8, %p2907_p7 }
  0x44   :  { %p2910_p10 = pnand %p2909_p9, %p2903_p6 }
  0x46   :  { %2913 = shalt.err (!%p2910_p10)
}
  0x47   :  { %147 = dma.hbm_to_vmem [thread:$0]  %s3603_s10, 16, %s145_s2, [#allocation19]  }
  0x48   :  { %s2922_s30 = scalar_lea.vmem %s167_s3, 16  ;;  %s2926_s8 = scalar_lea.vmem %s167_s3, 32 }
  0x49   :  { %p2923_p11 = scmp.ne.s32.totalorder %s167_s3, %s2922_s30  ;;  %p2927_p12 = scmp.lt.s32.totalorder %s167_s3, %s167_s3 }
  0x4a   :  { %p2928_p13 = scmp.lt.s32.totalorder %s2926_s8, %s2922_s30 }
  0x4c   :  { %p2929_p0 = por %p2928_p13, %p2927_p12 }
  0x4e   :  { %p2930_p1 = pnand %p2929_p0, %p2923_p11 }
  0x50   :  { %2933 = shalt.err (!%p2930_p1)
}
  0x51   :  { %169 = dma.hbm_to_vmem [thread:$0]  %s3605_s12, 16, %s167_s3, [#allocation22]  }
  0x52   :  { %s3182_s22 = smov [#allocation24]   ;;  %s3183_s23 = smov [#allocation3]  }
  0x53   :  { %s188_s28 = sshll.u32 %s3182_s22, 4  ;;  %s43_s1 = sshll.u32 %s3183_s23, 4  ;;  %s189_s28 = int_to_ptr.vmem [resolvable:$true] %s188_s28  ;;  %s44_s1 = int_to_ptr.vmem [resolvable:$true] %s43_s1 }
  0x54   :  { %s2942_s24 = scalar_lea.vmem %s189_s28, 16  ;;  %s2946_s10 = scalar_lea.vmem %s189_s28, 32 }
  0x55   :  { %p2943_p2 = scmp.ne.s32.totalorder %s189_s28, %s2942_s24  ;;  %p2947_p3 = scmp.lt.s32.totalorder %s189_s28, %s189_s28 }
  0x56   :  { %p2948_p4 = scmp.lt.s32.totalorder %s2946_s10, %s2942_s24 }
  0x58   :  { %p2949_p5 = por %p2948_p4, %p2947_p3 }
  0x5a   :  { %p2950_p6 = pnand %p2949_p5, %p2943_p2 }
  0x5c   :  { %2953 = shalt.err (!%p2950_p6)
}
  0x5d   :  { %191 = dma.hbm_to_vmem [thread:$0]  %s3607_s14, 16, %s189_s28, [#allocation25]  }
  0x5e   :  { %s2962_s4 = scalar_lea.vmem %s44_s1, 256  ;;  %p2967_p8 = scmp.lt.s32.totalorder %s44_s1, %s44_s1 }
  0x5f   :  { %p2963_p7 = scmp.ne.s32.totalorder %s44_s1, %s2962_s4  ;;  %p2968_p9 = scmp.lt.s32.totalorder %s2962_s4, %s2962_s4 }
  0x61   :  { %p2969_p10 = por %p2968_p9, %p2967_p8 }
  0x63   :  { %p2970_p11 = pnand %p2969_p10, %p2963_p7 }
  0x65   :  { %2973 = shalt.err (!%p2970_p11)
}
  0x66   :  { %s3623_s6 = sld [smem:[#allocation40_spill]]  ;;  %s3184_s26 = smov [#allocation8]  }
  0x67   :  { %s70_s27 = sshll.u32 %s3184_s26, 4  ;;  %s3185_s30 = smov [#allocation11]   ;;  %s71_s27 = int_to_ptr.vmem [resolvable:$true] %s70_s27 }
  0x68   :  { %s89_s8 = sshll.u32 %s3185_s30, 4  ;;  %s2982_s14 = scalar_lea.vmem %s71_s27, 16  ;;  %s90_s8 = int_to_ptr.vmem [resolvable:$true] %s89_s8 }
  0x69   :  { %p2983_p12 = scmp.ne.s32.totalorder %s71_s27, %s2982_s14  ;;  %s2986_s29 = scalar_lea.vmem %s71_s27, 32 }
  0x6a   :  { %p2987_p13 = scmp.lt.s32.totalorder %s71_s27, %s71_s27  ;;  %p2988_p0 = scmp.lt.s32.totalorder %s2986_s29, %s2982_s14 }
  0x6c   :  { %49 = dma.hbm_to_vmem [thread:$0]  %s3623_s6, 256, %s44_s1, [#allocation4], %s3176_s20, %s3176_s20, %s3177_s0  }
  0x6d   :  { %p2989_p1 = por %p2988_p0, %p2987_p13 }
  0x6f   :  { %p2990_p2 = pnand %p2989_p1, %p2983_p12 }
  0x71   :  { %2993 = shalt.err (!%p2990_p2)
}
  0x72   :  { %s3624_s28 = sld [smem:[#allocation43_spill]]  ;;  %s3002_s23 = scalar_lea.vmem %s90_s8, 512 }
  0x73   :  { %p3003_p3 = scmp.ne.s32.totalorder %s90_s8, %s3002_s23  ;;  %p3007_p4 = scmp.lt.s32.totalorder %s90_s8, %s90_s8 }
  0x74   :  { %p3008_p5 = scmp.lt.s32.totalorder %s3002_s23, %s3002_s23 }
  0x76   :  { %p3009_p6 = por %p3008_p5, %p3007_p4 }
  0x78   :  { %73 = dma.hbm_to_vmem [thread:$0]  %s3624_s28, 16, %s71_s27, [#allocation7]  }
  0x79   :  { %p3010_p7 = pnand %p3009_p6, %p3003_p3 }
  0x7b   :  { %3013 = shalt.err (!%p3010_p7)
}
  0x7c   :  { %s3625_s10 = sld [smem:[#allocation45_spill]]  ;;  %s3186_s2 = smov [#allocation14]  }
  0x7d   :  { %s111_s25 = sshll.u32 %s3186_s2, 4  ;;  %s3187_s4 = smov [#allocation17]   ;;  %s112_s25 = int_to_ptr.vmem [resolvable:$true] %s111_s25 }
  0x7e   :  { %s134_s12 = sshll.u32 %s3187_s4, 4  ;;  %s3022_s3 = scalar_lea.vmem %s112_s25, 512  ;;  %s135_s12 = int_to_ptr.vmem [resolvable:$true] %s134_s12 }
  0x7f   :  { %p3023_p8 = scmp.ne.s32.totalorder %s112_s25, %s3022_s3  ;;  %p3027_p9 = scmp.lt.s32.totalorder %s112_s25, %s112_s25 }
  0x80   :  { %p3028_p10 = scmp.lt.s32.totalorder %s3022_s3, %s3022_s3 }
  0x82   :  { %95 = dma.hbm_to_vmem [thread:$0]  %s3625_s10, 512, %s90_s8, [#allocation10], %s3176_s20, %s3176_s20, %s3177_s0  }
  0x83   :  { %p3029_p11 = por %p3028_p10, %p3027_p9 }
  0x85   :  { %p3030_p12 = pnand %p3029_p11, %p3023_p8 }
  0x87   :  { %3033 = shalt.err (!%p3030_p12)
}
  0x88   :  { %117 = dma.hbm_to_vmem [thread:$0]  %s3600_s7, 512, %s112_s25, [#allocation13], %s3176_s20, %s3176_s20, %s3177_s0  }
  0x89   :  { %s3042_s27 = scalar_lea.vmem %s135_s12, 16  ;;  %s3046_s30 = scalar_lea.vmem %s135_s12, 32 }
  0x8a   :  { %p3043_p13 = scmp.ne.s32.totalorder %s135_s12, %s3042_s27  ;;  %p3047_p0 = scmp.lt.s32.totalorder %s135_s12, %s135_s12 }
  0x8b   :  { %p3048_p1 = scmp.lt.s32.totalorder %s3046_s30, %s3042_s27 }
  0x8d   :  { %p3049_p2 = por %p3048_p1, %p3047_p0 }
  0x8f   :  { %p3050_p3 = pnand %p3049_p2, %p3043_p13 }
  0x91   :  { %3053 = shalt.err (!%p3050_p3)
}
  0x92   :  { %137 = dma.hbm_to_vmem [thread:$0]  %s3602_s9, 16, %s135_s12, [#allocation16]  }
  0x93   :  { %s3188_s29 = smov [#allocation20]   ;;  %s3189_s22 = smov [#allocation23]  }
  0x94   :  { %s153_s5 = sshll.u32 %s3188_s29, 4  ;;  %s175_s28 = sshll.u32 %s3189_s22, 4  ;;  %s154_s5 = int_to_ptr.vmem [resolvable:$true] %s153_s5  ;;  %s176_s28 = int_to_ptr.vmem [resolvable:$true] %s175_s28 }
  0x95   :  { %s3062_s23 = scalar_lea.vmem %s154_s5, 512  ;;  %p3067_p5 = scmp.lt.s32.totalorder %s154_s5, %s154_s5 }
  0x96   :  { %p3063_p4 = scmp.ne.s32.totalorder %s154_s5, %s3062_s23  ;;  %p3068_p6 = scmp.lt.s32.totalorder %s3062_s23, %s3062_s23 }
  0x98   :  { %p3069_p7 = por %p3068_p6, %p3067_p5 }
  0x9a   :  { %p3070_p8 = pnand %p3069_p7, %p3063_p4 }
  0x9c   :  { %3073 = shalt.err (!%p3070_p8)
}
  0x9d   :  { %159 = dma.hbm_to_vmem [thread:$0]  %s3604_s11, 512, %s154_s5, [#allocation19], %s3176_s20, %s3176_s20, %s3177_s0  }
  0x9e   :  { %s3082_s9 = scalar_lea.vmem %s176_s28, 512  ;;  %p3087_p10 = scmp.lt.s32.totalorder %s176_s28, %s176_s28 }
  0x9f   :  { %p3083_p9 = scmp.ne.s32.totalorder %s176_s28, %s3082_s9  ;;  %p3088_p11 = scmp.lt.s32.totalorder %s3082_s9, %s3082_s9 }
  0xa1   :  { %p3089_p12 = por %p3088_p11, %p3087_p10 }
  0xa3   :  { %p3090_p13 = pnand %p3089_p12, %p3083_p9 }
  0xa5   :  { %3093 = shalt.err (!%p3090_p13)
}
  0xa6   :  { %181 = dma.hbm_to_vmem [thread:$0]  %s3606_s13, 512, %s176_s28, [#allocation22], %s3176_s20, %s3176_s20, %s3177_s0  }
  0xa7   :  { %s3190_s2 = smov [#allocation26]   ;;  %s3191_s4 = smov [#allocation27]  }
  0xa8   :  { %s197_s25 = sshll.u32 %s3190_s2, 4  ;;  %s210_s12 = sshll.u32 %s3191_s4, 4  ;;  %s198_s25 = int_to_ptr.vmem [resolvable:$true] %s197_s25  ;;  %s211_s12 = int_to_ptr.vmem [resolvable:$true] %s210_s12 }
  0xa9   :  { %s3102_s11 = scalar_lea.vmem %s198_s25, 512  ;;  %p3107_p1 = scmp.lt.s32.totalorder %s198_s25, %s198_s25 }
  0xaa   :  { %p3103_p0 = scmp.ne.s32.totalorder %s198_s25, %s3102_s11  ;;  %p3108_p2 = scmp.lt.s32.totalorder %s3102_s11, %s3102_s11 }
  0xac   :  { %p3109_p3 = por %p3108_p2, %p3107_p1 }
  0xae   :  { %p3110_p4 = pnand %p3109_p3, %p3103_p0 }
  0xb0   :  { %3113 = shalt.err (!%p3110_p4)
}
  0xb1   :  { %203 = dma.hbm_to_vmem [thread:$0]  %s3608_s15, 512, %s198_s25, [#allocation25], %s3176_s20, %s3176_s20, %s3177_s0  }
  0xb2   :  { %s3122_s13 = scalar_lea.vmem %s211_s12, 16  ;;  %s3126_s26 = scalar_lea.vmem %s211_s12, 32 }
  0xb3   :  { %p3123_p5 = scmp.ne.s32.totalorder %s211_s12, %s3122_s13  ;;  %p3127_p6 = scmp.lt.s32.totalorder %s211_s12, %s211_s12 }
  0xb4   :  { %p3128_p7 = scmp.lt.s32.totalorder %s3126_s26, %s3122_s13 }
  0xb6   :  { %p3129_p8 = por %p3128_p7, %p3127_p6 }
  0xb8   :  { %p3130_p9 = pnand %p3129_p8, %p3123_p5 }
  0xba   :  { %3133 = shalt.err (!%p3130_p9)
}
  0xbb   :  { %213 = dma.hbm_to_vmem [thread:$0]  %s3609_s16, 16, %s211_s12, [#allocation28]  }
  0xbc   :  { %3154 = dma.done.wait [#allocation4], 256  }
  0xbd   :  { %3155 = vsyncadd [#allocation4], 4294967040 }
  0xbe   :  { %3156 = dma.done.wait [#allocation7], 272  }
  0xbf   :  { %3157 = vsyncadd [#allocation7], 4294967024 }
  0xc0   :  { %3158 = dma.done.wait [#allocation10], 528  }
  0xc1   :  { %3159 = vsyncadd [#allocation10], 4294966768 }
  0xc2   :  { %3160 = dma.done.wait [#allocation13], 528  }
  0xc3   :  { %3161 = vsyncadd [#allocation13], 4294966768 }
  0xc4   :  { %3162 = dma.done.wait [#allocation16], 32  }
  0xc5   :  { %3163 = vsyncadd [#allocation16], 4294967264 }
  0xc6   :  { %3164 = dma.done.wait [#allocation19], 528  }
  0xc7   :  { %3165 = vsyncadd [#allocation19], 4294966768 }
  0xc8   :  { %3166 = dma.done.wait [#allocation22], 528  }
  0xc9   :  { %3167 = vsyncadd [#allocation22], 4294966768 }
  0xca   :  { %3168 = dma.done.wait [#allocation25], 528  }
  0xcb   :  { %3169 = vsyncadd [#allocation25], 4294966768 }
  0xcc   :  { %3170 = dma.done.wait [#allocation28], 16  }
  0xcd   :  { %3171 = vsyncadd [#allocation28], 4294967280  ;;  %vm281_vm0 = vcmask 130048   ;;  %v273_v1 = vld [vmem:[#allocation6 + $0x8] sm:$0xff]  ;;  %v272_v2 = vld [vmem:[#allocation6] sm:$0xff]  ;;  %s3626_s20 = sld [smem:[#allocation42_spill]] }
  0xce   :  { %v270_v3 = vld [vmem:[#allocation3] sm:$0xff]  ;;  %2577 = vmatprep.subr.mxu0 %v273_v1  ;;  %v271_v4 = vld [vmem:[#allocation3 + $0x8] sm:$0xff]  ;;  %vm365_vm1 = vcmask 261120   ;;  %v411_v23 = vld [vmem:[#allocation11 + $0x10] sm:$0xff]  ;;  %v3192_v42 = vmov 0.0   ;;  %vm3193_vm2 = vmmov 0  }
  0xcf   :  { %2581 = vmatprep.mubr.msk.f32.mxu0 %vm281_vm0, %v270_v3  ;;  %2578 = vmatpush3.msra.mxu0 %v273_v1  ;;  %v412_v22 = vld [vmem:[#allocation11 + $0x18] sm:$0xff]  ;;  %v410_v24 = vld [vmem:[#allocation11 + $0x8] sm:$0xff]  ;;  %v409_v25 = vld [vmem:[#allocation11] sm:$0xff]  ;;  %s3194_s8 = smov 96   ;;  %vm504_vm3 = vcmask 64512   ;;  %s3195_s14 = smov 64  }
  0xd0   :  { %2579 = vmatprep.subr.mxu0 %v272_v2  ;;  %2584 = vmatprep.subr.mxu1 %v412_v22  ;;  %v2455_v33 = vld [vmem:[#allocation8] ss:$0 sm:$0xff]  ;;  %v2456_v35 = vld [vmem:[#allocation9] ss:$0 sm:$0xff]  ;;  %v2457_v43 = vld [vmem:[#allocation12] ss:$0 sm:$0xff] }
  0xd1   :  { %2580 = vmatpush3.msra.mxu0 %v272_v2  ;;  %2585 = vmatpush3.msra.mxu1 %v412_v22  ;;  %s3196_s29 = smov 88   ;;  %s3197_s5 = smov 120   ;;  %vm1856_vm4 = vcmask 195584   ;;  %vm2424_vm5 = vcmask 1041409   ;;  %vm2427_vm6 = vcmask 58368  }
  0xd2   :  { %2582 = vmatmul.mubr.msk.f32.vlgmr.msra.gmra.mxu0 %vm281_vm0, %v271_v4  ;;  %2586 = vmatprep.subr.mxu1 %v411_v23  ;;  %s3198_s22 = smov 56   ;;  %s3199_s28 = smov 80  }
  0xd3   :  { %v2452_v6 = vld [vmem:[%s3626_s20] ss:$0 sm:$0xff]  ;;  %2587 = vmatpush3.msra.mxu1 %v411_v23  ;;  %2595 = vmatprep.subr.mxu0 %v3192_v42  ;;  %s3200_s23 = smov 112   ;;  %s3201_s7 = smov 48  }
  0xd4   :  { %2588 = vmatprep.subr.mxu1 %v410_v24  ;;  %2597 = vmatprep.mubr.msk.f32.mxu0 %vm3193_vm2, %v3192_v42  ;;  %s3202_s1 = smov 72   ;;  %s3203_s9 = smov 104  }
  0xd5   :  { %2589 = vmatpush3.msra.mxu1 %v410_v24  ;;  %s3204_s24 = smov 40   ;;  %s3205_s10 = smov 16  }
  0xd6   :  { %2590 = vmatprep.subr.mxu1 %v409_v25 }
  0xd7   :  { %2591 = vmatpush3.msra.mxu1 %v409_v25 }
  0xd8   :  { %2605 = vmatprep.subr.mxu1 %v3192_v42 }
 0x192   :  { %v2583_v5 = vpop.f32.mrf.mxu0 }
 0x193   :  { %v3398_v9 = vadd.f32 %v2583_v5, %v2452_v6 }
 0x194   :  { %v354_v7 = vpop.f32.mrf.mxu0 }
 0x195   :  { %v3396_v8 = vadd.f32 %v2452_v6, %v354_v7  ;;  %v369_v11 = vsel %vm365_vm1, %v3398_v9, 0.0 }
 0x197   :  { %v366_v10 = vsel %vm365_vm1, %v3396_v8, 0.0 }
 0x198   :  { %367 = vadd.xlane.f32.xlu0 %v366_v10 }
 0x19c   :  { %370 = vadd.xlane.f32.xlu0 %v369_v11 }
 0x221   :  { %v368_v12 = vpop.xlane.xlu0 %367 }
 0x222   :  { %v373_v13 = vmul.f32 0.03125, %v368_v12 }
 0x224   :  { %v375_v14 = vsub.f32 %v3396_v8, %v373_v13 }
 0x225   :  { %v371_v15 = vpop.xlane.xlu0 %370 }
 0x226   :  { %v374_v16 = vmul.f32 0.03125, %v371_v15  ;;  %v377_v17 = vmul.f32 %v375_v14, %v375_v14 }
 0x228   :  { %v376_v18 = vsub.f32 %v3398_v9, %v374_v16  ;;  %v379_v19 = vsel %vm365_vm1, %v377_v17, 0.0 }
 0x229   :  { %380 = vadd.xlane.f32.xlu1 %v379_v19 }
 0x22a   :  { %v378_v20 = vmul.f32 %v376_v18, %v376_v18 }
 0x22c   :  { %v382_v21 = vsel %vm365_vm1, %v378_v20, 0.0 }
 0x22d   :  { %383 = vadd.xlane.f32.xlu1 %v382_v21 }
 0x2b2   :  { %v381_v26 = vpop.xlane.xlu1 %380 }
 0x2b3   :  { %v385_v27 = vmul.f32 0.03125, %v381_v26 }
 0x2b5   :  { %v387_v28 = vadd.f32 1e-05, %v385_v27 }
 0x2b6   :  { %v384_v29 = vpop.xlane.xlu1 %383 }
 0x2b7   :  { %2766 = vrsqrt.f32 %v387_v28  ;;  %v386_v30 = vmul.f32 0.03125, %v384_v29 }
 0x2b9   :  { %v388_v31 = vadd.f32 1e-05, %v386_v30 }
 0x2bb   :  { %2768 = vrsqrt.f32 %v388_v31 }
 0x2c4   :  { %v2767_v32 = vpop.eup %2766 }
 0x2c5   :  { %v391_v34 = vmul.f32 %v2767_v32, %v375_v14 }
 0x2c7   :  { %v399_v36 = vmul.f32 %v2455_v33, %v391_v34 }
 0x2c8   :  { %v2769_v37 = vpop.eup %2768 }
 0x2c9   :  { %v392_v38 = vmul.f32 %v2769_v37, %v376_v18  ;;  %v407_v39 = vadd.f32 %v2456_v35, %v399_v36 }
 0x2cb   :  { %v400_v40 = vmul.f32 %v2455_v33, %v392_v38  ;;  %2592 = vmatprep.mubr.msk.f32.mxu1 %vm365_vm1, %v407_v39 }
 0x2cd   :  { %v408_v41 = vadd.f32 %v2456_v35, %v400_v40 }
 0x2cf   :  { %2593 = vmatmul.mubr.msk.f32.vlgmr.msra.gmra.mxu1 %vm365_vm1, %v408_v41 }
 0x2d0   :  { %2607 = vmatprep.mubr.msk.f32.mxu1 %vm3193_vm2, %v3192_v42 }
 0x38f   :  { %v2594_v44 = vpop.f32.mrf.mxu1 }
 0x390   :  { %v3416_v45 = vadd.f32 %v2594_v44, %v2457_v43 }
 0x391   :  { %v492_v46 = vpop.f32.mrf.mxu1 }
 0x392   :  { %v3418_v47 = vadd.f32 %v2457_v43, %v492_v46  ;;  %580 = vrot.lane.b32.xlu1 %v3416_v45, %s3194_s8 }
 0x394   :  { %502 = vrot.lane.b32.xlu0 %v3418_v47, %s3194_s8 }
 0x404   :  { %v581_v49 = vpop.permute.xlu1 %580 }
 0x406   :  { %v503_v48 = vpop.permute.xlu0 %502 }
 0x407   :  { %2596 = vmatpush3.xpose.msk.msra.mxu0 %vm504_vm3, %v503_v48 }
 0x408   :  { %2600 = vmatprep.subr.mxu0 %v3192_v42 }
 0x40a   :  { %2598 = vmatmul.mubr.msk.f32.vlgmr.msra.gmra.mxu0 %vm504_vm3, %v3418_v47 }
 0x40b   :  { %2601 = vmatpush3.xpose.msk.msra.mxu0 %vm504_vm3, %v581_v49  ;;  %2602 = vmatprep.mubr.msk.f32.mxu0 %vm3193_vm2, %v3192_v42 }
 0x40c   :  { %2610 = vmatprep.subr.mxu0 %v3192_v42 }
 0x40e   :  { %2603 = vmatmul.mubr.msk.f32.vlgmr.msra.gmra.mxu0 %vm504_vm3, %v3416_v45 }
 0x40f   :  { %2612 = vmatprep.mubr.msk.f32.mxu0 %vm3193_vm2, %v3192_v42 }
 0x4ca   :  { %v575_v50 = vpop.f32.mrf.mxu0 }
 0x4cb   :  { %v656_v51 = vmul.f32 0.35355338, %v575_v50 }
 0x4cc   :  { %v2599_v52 = vpop.f32.mrf.mxu0 }
 0x4cd   :  { %v658_v53 = vsel %vm504_vm3, %v656_v51, -inf }
 0x4ce   :  { %659 = vmax.xlane.f32.xlu1 %v658_v53  ;;  %v652_v54 = vpop.f32.mrf.mxu0 }
 0x4cf   :  { %v657_v55 = vmul.f32 0.35355338, %v652_v54 }
 0x4d0   :  { %v2604_v56 = vpop.f32.mrf.mxu0 }
 0x4d1   :  { %v661_v57 = vsel %vm504_vm3, %v657_v55, -inf }
 0x4d2   :  { %662 = vmax.xlane.f32.xlu0 %v661_v57 }
 0x4df   :  { %756 = vrot.lane.b32.xlu1 %v3416_v45, %s3195_s14 }
 0x4e3   :  { %834 = vrot.lane.b32.xlu1 %v3418_v47, %s3196_s29 }
 0x4e7   :  { %912 = vrot.lane.b32.xlu1 %v3416_v45, %s3196_s29 }
 0x557   :  { %v660_v58 = vpop.xlane.xlu1 %659 }
 0x558   :  { %v664_v59 = vsub.f32 %v656_v51, %v660_v58 }
 0x55a   :  { %v666_v60 = vmul.f32 1.442695, %v664_v59 }
 0x55b   :  { %v757_v61 = vpop.permute.xlu1 %756  ;;  %v663_v62 = vpop.xlane.xlu0 %662 }
 0x55c   :  { %2770 = vpow2.f32 %v666_v60  ;;  %v665_v63 = vsub.f32 %v657_v55, %v663_v62  ;;  %2611 = vmatpush3.msra.mxu0 %v757_v61 }
 0x55d   :  { %2620 = vmatprep.subr.mxu0 %v3192_v42 }
 0x55e   :  { %v668_v0 = vmul.f32 1.442695, %v665_v63 }
 0x55f   :  { %v835_v5 = vpop.permute.xlu1 %834 }
 0x560   :  { %2772 = vpow2.f32 %v668_v0 }
 0x563   :  { %v913_v6 = vpop.permute.xlu1 %912 }
 0x569   :  { %v2771_v1 = vpop.eup %2770 }
 0x56a   :  { %v670_v2 = vsel %vm504_vm3, %v2771_v1, 0.0 }
 0x56b   :  { %671 = vadd.xlane.f32.xlu0 %v670_v2 }
 0x56d   :  { %v2773_v3 = vpop.eup %2772 }
 0x56e   :  { %v673_v4 = vsel %vm504_vm3, %v2773_v3, 0.0 }
 0x56f   :  { %674 = vadd.xlane.f32.xlu1 %v673_v4 }
 0x580   :  { %910 = vrot.lane.b32.xlu1 %v3416_v45, %s3197_s5 }
 0x581   :  { %680 = vrot.lane.b32.xlu0 %v3418_v47, %s3195_s14 }
 0x585   :  { %832 = vrot.lane.b32.xlu0 %v3418_v47, %s3197_s5 }
 0x5f4   :  { %v672_v7 = vpop.xlane.xlu0 %671 }
 0x5f5   :  { %2774 = vrcp.f32 %v672_v7 }
 0x5f8   :  { %v675_v10 = vpop.xlane.xlu1 %674  ;;  %v681_v11 = vpop.permute.xlu0 %680 }
 0x5f9   :  { %2776 = vrcp.f32 %v675_v10  ;;  %2606 = vmatpush3.msra.mxu1 %v681_v11 }
 0x5fa   :  { %2615 = vmatprep.subr.mxu1 %v3192_v42 }
 0x5fc   :  { %v833_v16 = vpop.permute.xlu0 %832  ;;  %v911_v17 = vpop.permute.xlu1 %910 }
 0x602   :  { %v2775_v12 = vpop.eup %2774 }
 0x603   :  { %v678_v13 = vmul.f32 %v2775_v12, %v2771_v1 }
 0x605   :  { %2608 = vmatmul.mubr.msk.f32.vlgmr.msra.gmra.mxu1 %vm504_vm3, %v678_v13 }
 0x606   :  { %v2777_v14 = vpop.eup %2776  ;;  %2616 = vmatpush3.xpose.msk.msra.mxu1 %vm504_vm3, %v835_v5  ;;  %2617 = vmatprep.mubr.msk.f32.mxu1 %vm3193_vm2, %v3192_v42 }
 0x607   :  { %v679_v15 = vmul.f32 %v2777_v14, %v2773_v3  ;;  %2625 = vmatprep.subr.mxu1 %v3192_v42 }
 0x609   :  { %2613 = vmatmul.mubr.msk.f32.vlgmr.msra.gmra.mxu0 %vm504_vm3, %v679_v15  ;;  %2618 = vmatmul.mubr.msk.f32.vlgmr.msra.gmra.mxu1 %vm504_vm3, %v833_v16 }
 0x60a   :  { %2621 = vmatpush3.xpose.msk.msra.mxu0 %vm504_vm3, %v913_v6  ;;  %2622 = vmatprep.mubr.msk.f32.mxu0 %vm3193_vm2, %v3192_v42 }
 0x60b   :  { %2630 = vmatprep.subr.mxu0 %v3192_v42  ;;  %2627 = vmatprep.mubr.msk.f32.mxu1 %vm3193_vm2, %v3192_v42 }
 0x60d   :  { %2623 = vmatmul.mubr.msk.f32.vlgmr.msra.gmra.mxu0 %vm504_vm3, %v911_v17 }
 0x60e   :  { %2632 = vmatprep.mubr.msk.f32.mxu0 %vm3193_vm2, %v3192_v42 }
 0x6c5   :  { %v3462_v18 = vpop.f32.mrf.mxu1 }
 0x6c7   :  { %v2609_v19 = vpop.f32.mrf.mxu1 }
 0x6c9   :  { %v3464_v20 = vpop.f32.mrf.mxu0  ;;  %v906_v21 = vpop.f32.mrf.mxu1 }
 0x6ca   :  { %v988_v22 = vmul.f32 0.35355338, %v906_v21 }
 0x6cb   :  { %v2614_v23 = vpop.f32.mrf.mxu0  ;;  %v2619_v24 = vpop.f32.mrf.mxu1 }
 0x6cc   :  { %v990_v25 = vsel %vm504_vm3, %v988_v22, -inf }
 0x6cd   :  { %991 = vmax.xlane.f32.xlu0 %v990_v25  ;;  %v984_v26 = vpop.f32.mrf.mxu0 }
 0x6ce   :  { %v989_v27 = vmul.f32 0.35355338, %v984_v26 }
 0x6cf   :  { %v2624_v28 = vpop.f32.mrf.mxu0 }
 0x6d0   :  { %v993_v29 = vsel %vm504_vm3, %v989_v27, -inf }
 0x6d1   :  { %994 = vmax.xlane.f32.xlu1 %v993_v29 }
 0x6e2   :  { %1088 = vrot.lane.b32.xlu1 %v3416_v45, %s3198_s22 }
 0x6e3   :  { %1012 = vrot.lane.b32.xlu0 %v3418_v47, %s3198_s22 }
 0x6e6   :  { %1166 = vrot.lane.b32.xlu1 %v3418_v47, %s3199_s28 }
 0x6ea   :  { %1244 = vrot.lane.b32.xlu1 %v3416_v45, %s3199_s28 }
 0x6ee   :  { %1242 = vrot.lane.b32.xlu1 %v3416_v45, %s3200_s23 }
 0x756   :  { %v992_v30 = vpop.xlane.xlu0 %991 }
 0x757   :  { %v996_v31 = vsub.f32 %v988_v22, %v992_v30 }
 0x759   :  { %v998_v32 = vmul.f32 1.442695, %v996_v31 }
 0x75a   :  { %v1013_v33 = vpop.permute.xlu0 %1012  ;;  %v995_v34 = vpop.xlane.xlu1 %994 }
 0x75b   :  { %2778 = vpow2.f32 %v998_v32  ;;  %v997_v35 = vsub.f32 %v989_v27, %v995_v34  ;;  %2626 = vmatpush3.msra.mxu1 %v1013_v33 }
 0x75c   :  { %2635 = vmatprep.subr.mxu1 %v3192_v42 }
 0x75d   :  { %v1000_v36 = vmul.f32 1.442695, %v997_v35 }
 0x75e   :  { %v1089_v37 = vpop.permute.xlu1 %1088 }
 0x75f   :  { %2780 = vpow2.f32 %v1000_v36  ;;  %2631 = vmatpush3.msra.mxu0 %v1089_v37 }
 0x760   :  { %2640 = vmatprep.subr.mxu0 %v3192_v42 }
 0x762   :  { %v1167_v46 = vpop.permute.xlu1 %1166 }
 0x766   :  { %v1245_v51 = vpop.permute.xlu1 %1244 }
 0x768   :  { %v2779_v38 = vpop.eup %2778 }
 0x769   :  { %v1002_v39 = vsel %vm504_vm3, %v2779_v38, 0.0 }
 0x76a   :  { %1003 = vadd.xlane.f32.xlu0 %v1002_v39  ;;  %v1243_v54 = vpop.permute.xlu1 %1242 }
 0x76c   :  { %v2781_v40 = vpop.eup %2780 }
 0x76d   :  { %v1005_v41 = vsel %vm504_vm3, %v2781_v40, 0.0 }
 0x76e   :  { %1006 = vadd.xlane.f32.xlu0 %v1005_v41 }
 0x784   :  { %1164 = vrot.lane.b32.xlu0 %v3418_v47, %s3200_s23 }
 0x7f3   :  { %v1004_v43 = vpop.xlane.xlu0 %1003 }
 0x7f4   :  { %2782 = vrcp.f32 %v1004_v43 }
 0x7f7   :  { %v1007_v44 = vpop.xlane.xlu0 %1006 }
 0x7f8   :  { %2784 = vrcp.f32 %v1007_v44 }
 0x7fb   :  { %v1165_v53 = vpop.permute.xlu0 %1164 }
 0x801   :  { %v2783_v48 = vpop.eup %2782 }
 0x802   :  { %v1010_v49 = vmul.f32 %v2783_v48, %v2779_v38 }
 0x804   :  { %2628 = vmatmul.mubr.msk.f32.vlgmr.msra.gmra.mxu1 %vm504_vm3, %v1010_v49 }
 0x805   :  { %v2785_v50 = vpop.eup %2784  ;;  %2636 = vmatpush3.xpose.msk.msra.mxu1 %vm504_vm3, %v1167_v46  ;;  %2637 = vmatprep.mubr.msk.f32.mxu1 %vm3193_vm2, %v3192_v42 }
 0x806   :  { %v1011_v52 = vmul.f32 %v2785_v50, %v2781_v40  ;;  %2645 = vmatprep.subr.mxu1 %v3192_v42 }
 0x808   :  { %2633 = vmatmul.mubr.msk.f32.vlgmr.msra.gmra.mxu0 %vm504_vm3, %v1011_v52  ;;  %2638 = vmatmul.mubr.msk.f32.vlgmr.msra.gmra.mxu1 %vm504_vm3, %v1165_v53 }
 0x809   :  { %2641 = vmatpush3.xpose.msk.msra.mxu0 %vm504_vm3, %v1245_v51  ;;  %2642 = vmatprep.mubr.msk.f32.mxu0 %vm3193_vm2, %v3192_v42 }
 0x80a   :  { %2650 = vmatprep.subr.mxu0 %v3192_v42  ;;  %2647 = vmatprep.mubr.msk.f32.mxu1 %vm3193_vm2, %v3192_v42 }
 0x80c   :  { %2643 = vmatmul.mubr.msk.f32.vlgmr.msra.gmra.mxu0 %vm504_vm3, %v1243_v54 }
 0x80d   :  { %2652 = vmatprep.mubr.msk.f32.mxu0 %vm3193_vm2, %v3192_v42 }
 0x8c4   :  { %v3494_v55 = vpop.f32.mrf.mxu1 }
 0x8c6   :  { %v2629_v56 = vpop.f32.mrf.mxu1 }
 0x8c8   :  { %v3496_v57 = vpop.f32.mrf.mxu0  ;;  %v1238_v58 = vpop.f32.mrf.mxu1 }
 0x8c9   :  { %v1320_v59 = vmul.f32 0.35355338, %v1238_v58 }
 0x8ca   :  { %v2634_v60 = vpop.f32.mrf.mxu0  ;;  %v2639_v61 = vpop.f32.mrf.mxu1 }
 0x8cb   :  { %v1322_v62 = vsel %vm504_vm3, %v1320_v59, -inf  ;;  %v1862_v60 = vld [vmem:[#allocation14 + $0x18] sm:$0xff]  ;;  %v1861_v61 = vld [vmem:[#allocation14 + $0x10] sm:$0xff] }
 0x8cc   :  { %1323 = vmax.xlane.f32.xlu0 %v1322_v62  ;;  %v1316_v63 = vpop.f32.mrf.mxu0  ;;  %v1859_v62 = vld [vmem:[#allocation14] sm:$0xff] }
 0x8cd   :  { %v1321_v0 = vmul.f32 0.35355338, %v1316_v63 }
 0x8ce   :  { %v2644_v1 = vpop.f32.mrf.mxu0 }
 0x8cf   :  { %v1325_v2 = vsel %vm504_vm3, %v1321_v0, -inf }
 0x8d0   :  { %1326 = vmax.xlane.f32.xlu1 %v1325_v2 }
 0x8e1   :  { %1420 = vrot.lane.b32.xlu1 %v3416_v45, %s3201_s7 }
 0x8e2   :  { %1344 = vrot.lane.b32.xlu0 %v3418_v47, %s3201_s7 }
 0x8e5   :  { %1498 = vrot.lane.b32.xlu1 %v3418_v47, %s3202_s1 }
 0x8e9   :  { %1576 = vrot.lane.b32.xlu1 %v3416_v45, %s3202_s1 }
 0x8ed   :  { %1574 = vrot.lane.b32.xlu1 %v3416_v45, %s3203_s9 }
 0x955   :  { %v1324_v3 = vpop.xlane.xlu0 %1323 }
 0x956   :  { %v1328_v4 = vsub.f32 %v1320_v59, %v1324_v3 }
 0x958   :  { %v1330_v5 = vmul.f32 1.442695, %v1328_v4 }
 0x959   :  { %v1345_v6 = vpop.permute.xlu0 %1344  ;;  %v1327_v7 = vpop.xlane.xlu1 %1326 }
 0x95a   :  { %2786 = vpow2.f32 %v1330_v5  ;;  %v1329_v10 = vsub.f32 %v1321_v0, %v1327_v7  ;;  %2646 = vmatpush3.msra.mxu1 %v1345_v6 }
 0x95b   :  { %2655 = vmatprep.subr.mxu1 %v3192_v42 }
 0x95c   :  { %v1332_v11 = vmul.f32 1.442695, %v1329_v10 }
 0x95d   :  { %v1421_v12 = vpop.permute.xlu1 %1420 }
 0x95e   :  { %2788 = vpow2.f32 %v1332_v11  ;;  %2651 = vmatpush3.msra.mxu0 %v1421_v12 }
 0x95f   :  { %2660 = vmatprep.subr.mxu0 %v3192_v42 }
 0x961   :  { %v1499_v21 = vpop.permute.xlu1 %1498 }
 0x965   :  { %v1577_v25 = vpop.permute.xlu1 %1576 }
 0x967   :  { %v2787_v13 = vpop.eup %2786 }
 0x968   :  { %v1334_v14 = vsel %vm504_vm3, %v2787_v13, 0.0 }
 0x969   :  { %1335 = vadd.xlane.f32.xlu0 %v1334_v14  ;;  %v1575_v28 = vpop.permute.xlu1 %1574 }
 0x96b   :  { %v2789_v15 = vpop.eup %2788 }
 0x96c   :  { %v1337_v16 = vsel %vm504_vm3, %v2789_v15, 0.0 }
 0x96d   :  { %1338 = vadd.xlane.f32.xlu0 %v1337_v16 }
 0x983   :  { %1496 = vrot.lane.b32.xlu0 %v3418_v47, %s3203_s9 }
 0x9f2   :  { %v1336_v17 = vpop.xlane.xlu0 %1335 }
 0x9f3   :  { %2790 = vrcp.f32 %v1336_v17  ;;  %v2484_v17 = vld [vmem:[#allocation15] ss:$0 sm:$0xff] }
 0x9f6   :  { %v1339_v19 = vpop.xlane.xlu0 %1338 }
 0x9f7   :  { %2792 = vrcp.f32 %v1339_v19 }
 0x9fa   :  { %v1497_v27 = vpop.permute.xlu0 %1496 }
 0xa00   :  { %v2791_v22 = vpop.eup %2790 }
 0xa01   :  { %v1342_v23 = vmul.f32 %v2791_v22, %v2787_v13 }
 0xa03   :  { %2648 = vmatmul.mubr.msk.f32.vlgmr.msra.gmra.mxu1 %vm504_vm3, %v1342_v23 }
 0xa04   :  { %v2793_v24 = vpop.eup %2792  ;;  %2656 = vmatpush3.xpose.msk.msra.mxu1 %vm504_vm3, %v1499_v21  ;;  %2657 = vmatprep.mubr.msk.f32.mxu1 %vm3193_vm2, %v3192_v42 }
 0xa05   :  { %v1343_v26 = vmul.f32 %v2793_v24, %v2789_v15  ;;  %2665 = vmatprep.subr.mxu1 %v3192_v42 }
 0xa07   :  { %2653 = vmatmul.mubr.msk.f32.vlgmr.msra.gmra.mxu0 %vm504_vm3, %v1343_v26  ;;  %2658 = vmatmul.mubr.msk.f32.vlgmr.msra.gmra.mxu1 %vm504_vm3, %v1497_v27 }
 0xa08   :  { %2661 = vmatpush3.xpose.msk.msra.mxu0 %vm504_vm3, %v1577_v25  ;;  %2662 = vmatprep.mubr.msk.f32.mxu0 %vm3193_vm2, %v3192_v42 }
 0xa09   :  { %2670 = vmatprep.subr.mxu0 %v3192_v42  ;;  %2667 = vmatprep.mubr.msk.f32.mxu1 %vm3193_vm2, %v3192_v42 }
 0xa0b   :  { %2663 = vmatmul.mubr.msk.f32.vlgmr.msra.gmra.mxu0 %vm504_vm3, %v1575_v28 }
 0xa0c   :  { %2672 = vmatprep.mubr.msk.f32.mxu0 %vm3193_vm2, %v3192_v42 }
 0xac3   :  { %v1416_v29 = vpop.f32.mrf.mxu1 }
 0xac5   :  { %v2649_v30 = vpop.f32.mrf.mxu1 }
 0xac7   :  { %v1492_v31 = vpop.f32.mrf.mxu0  ;;  %v1570_v32 = vpop.f32.mrf.mxu1 }
 0xac8   :  { %v1652_v33 = vmul.f32 0.35355338, %v1570_v32 }
 0xac9   :  { %v2654_v34 = vpop.f32.mrf.mxu0  ;;  %v2659_v35 = vpop.f32.mrf.mxu1 }
 0xaca   :  { %v1654_v36 = vsel %vm504_vm3, %v1652_v33, -inf  ;;  %v2000_v34 = vld [vmem:[#allocation20 + $0x18] sm:$0xff]  ;;  %v1999_v35 = vld [vmem:[#allocation20 + $0x10] sm:$0xff] }
 0xacb   :  { %1655 = vmax.xlane.f32.xlu0 %v1654_v36  ;;  %v1648_v37 = vpop.f32.mrf.mxu0  ;;  %v1998_v36 = vld [vmem:[#allocation20 + $0x8] sm:$0xff] }
 0xacc   :  { %v1653_v38 = vmul.f32 0.35355338, %v1648_v37  ;;  %v1997_v37 = vld [vmem:[#allocation20] sm:$0xff] }
 0xacd   :  { %v2664_v39 = vpop.f32.mrf.mxu0 }
 0xace   :  { %v1657_v40 = vsel %vm504_vm3, %v1653_v38, -inf }
 0xacf   :  { %1658 = vmax.xlane.f32.xlu1 %v1657_v40 }
 0xae0   :  { %1752 = vrot.lane.b32.xlu1 %v3416_v45, %s3204_s24 }
 0xae4   :  { %1830 = vrot.lane.b32.xlu1 %v3494_v55, %s3177_s0 }
 0xae8   :  { %1832 = vrot.lane.b32.xlu1 %v3496_v57, %s3177_s0  ;;  %s3206_s0 = smov 24  }
 0xaec   :  { %1840 = vrot.lane.b32.xlu1 %v1492_v31, %s3205_s10 }
 0xb54   :  { %v1656_v42 = vpop.xlane.xlu0 %1655 }
 0xb55   :  { %v1660_v41 = vsub.f32 %v1652_v33, %v1656_v42 }
 0xb57   :  { %v1662_v43 = vmul.f32 1.442695, %v1660_v41 }
 0xb58   :  { %v1659_v44 = vpop.xlane.xlu1 %1658 }
 0xb59   :  { %2794 = vpow2.f32 %v1662_v43  ;;  %v1661_v46 = vsub.f32 %v1653_v38, %v1659_v44 }
 0xb5b   :  { %v1664_v48 = vmul.f32 1.442695, %v1661_v46  ;;  %v2487_v46 = vld [vmem:[#allocation17] ss:$0 sm:$0xff] }
 0xb5c   :  { %v1753_v49 = vpop.permute.xlu1 %1752 }
 0xb5d   :  { %2796 = vpow2.f32 %v1664_v48  ;;  %2671 = vmatpush3.msra.mxu0 %v1753_v49  ;;  %v2488_v49 = vld [vmem:[#allocation18] ss:$0 sm:$0xff] }
 0xb5e   :  { %2686 = vmatprep.subr.mxu0 %v2000_v34 }
 0xb60   :  { %v1831_v3 = vpop.permute.xlu1 %1830 }
 0xb61   :  { %v1852_v6 = vsel %vm504_vm3, %v3462_v18, %v1831_v3  ;;  %v2186_v3 = vld [vmem:[#allocation26 + $0x8] sm:$0xff] }
 0xb64   :  { %v1833_v4 = vpop.permute.xlu1 %1832 }
 0xb65   :  { %v1853_v13 = vsel %vm504_vm3, %v3464_v20, %v1833_v4  ;;  %v2185_v4 = vld [vmem:[#allocation26] sm:$0xff] }
 0xb66   :  { %v2795_v50 = vpop.eup %2794 }
 0xb67   :  { %v1666_v45 = vsel %vm504_vm3, %v2795_v50, 0.0 }
 0xb68   :  { %1667 = vadd.xlane.f32.xlu0 %v1666_v45  ;;  %v1841_v7 = vpop.permute.xlu1 %1840 }
 0xb69   :  { %v1855_v14 = vsel %vm281_vm0, %v1853_v13, %v1841_v7 }
 0xb6a   :  { %v2797_v51 = vpop.eup %2796 }
 0xb6b   :  { %v1669_v52 = vsel %vm504_vm3, %v2797_v51, 0.0 }
 0xb6c   :  { %1670 = vadd.xlane.f32.xlu0 %v1669_v52 }
 0xb82   :  { %1676 = vrot.lane.b32.xlu0 %v3418_v47, %s3204_s24  ;;  %v1860_v47 = vld [vmem:[#allocation14 + $0x8] sm:$0xff] }
 0xb86   :  { %1838 = vrot.lane.b32.xlu0 %v1416_v29, %s3205_s10 }
 0xbf1   :  { %v1668_v53 = vpop.xlane.xlu0 %1667 }
 0xbf2   :  { %2798 = vrcp.f32 %v1668_v53 }
 0xbf5   :  { %v1671_v54 = vpop.xlane.xlu0 %1670 }
 0xbf6   :  { %2800 = vrcp.f32 %v1671_v54 }
 0xbf9   :  { %v1677_v55 = vpop.permute.xlu0 %1676 }
 0xbfa   :  { %2666 = vmatpush3.msra.mxu1 %v1677_v55  ;;  %v2094_v55 = vld [vmem:[#allocation23 + $0x18] sm:$0xff] }
 0xbfb   :  { %2675 = vmatprep.subr.mxu1 %v1862_v60 }
 0xbfd   :  { %v1839_v5 = vpop.permute.xlu0 %1838 }
 0xbfe   :  { %v1854_v10 = vsel %vm281_vm0, %v1852_v6, %v1839_v5  ;;  %v2492_v5 = vld [vmem:[#allocation24] ss:$0 sm:$0xff] }
 0xbff   :  { %v2799_v56 = vpop.eup %2798 }
 0xc00   :  { %v1674_v57 = vmul.f32 %v2799_v56, %v2795_v50  ;;  %v2093_v56 = vld [vmem:[#allocation23 + $0x10] sm:$0xff] }
 0xc02   :  { %2668 = vmatmul.mubr.msk.f32.vlgmr.msra.gmra.mxu1 %vm504_vm3, %v1674_v57  ;;  %v2092_v57 = vld [vmem:[#allocation23 + $0x8] sm:$0xff] }
 0xc03   :  { %v2801_v58 = vpop.eup %2800  ;;  %2676 = vmatpush3.msra.mxu1 %v1862_v60 }
 0xc04   :  { %v1675_v59 = vmul.f32 %v2801_v58, %v2797_v51  ;;  %2677 = vmatprep.subr.mxu1 %v1861_v61  ;;  %v2091_v58 = vld [vmem:[#allocation23] sm:$0xff] }
 0xc05   :  { %2678 = vmatpush3.msra.mxu1 %v1861_v61 }
 0xc06   :  { %2673 = vmatmul.mubr.msk.f32.vlgmr.msra.gmra.mxu0 %vm504_vm3, %v1675_v59  ;;  %2679 = vmatprep.subr.mxu1 %v1860_v47  ;;  %v2489_v59 = vld [vmem:[#allocation21] ss:$0 sm:$0xff] }
 0xc07   :  { %2680 = vmatpush3.msra.mxu1 %v1860_v47  ;;  %2687 = vmatpush3.msra.mxu0 %v2000_v34 }
 0xc08   :  { %2681 = vmatprep.subr.mxu1 %v1859_v62  ;;  %2688 = vmatprep.subr.mxu0 %v1999_v35 }
 0xc09   :  { %2682 = vmatpush3.msra.mxu1 %v1859_v62  ;;  %2689 = vmatpush3.msra.mxu0 %v1999_v35 }
 0xc0a   :  { %2690 = vmatprep.subr.mxu0 %v1998_v36  ;;  %2697 = vmatprep.subr.mxu1 %v2094_v55 }
 0xc0b   :  { %2691 = vmatpush3.msra.mxu0 %v1998_v36  ;;  %v2502_v36 = vld [vmem:[#allocation2] ss:$0 sm:$0xff] }
 0xc0c   :  { %2692 = vmatprep.subr.mxu0 %v1997_v37 }
 0xc0d   :  { %2693 = vmatpush3.msra.mxu0 %v1997_v37 }
 0xcc2   :  { %v1748_v63 = vpop.f32.mrf.mxu1 }
 0xcc3   :  { %1846 = vrot.lane.b32.xlu0 %v1748_v63, %s3206_s0 }
 0xcc4   :  { %v2669_v0 = vpop.f32.mrf.mxu1 }
 0xcc6   :  { %v1824_v1 = vpop.f32.mrf.mxu0 }
 0xcc7   :  { %1848 = vrot.lane.b32.xlu1 %v1824_v1, %s3206_s0  ;;  %v2188_v1 = vld [vmem:[#allocation26 + $0x18] sm:$0xff] }
 0xcc8   :  { %v2674_v2 = vpop.f32.mrf.mxu0  ;;  %2708 = vmatprep.subr.mxu0 %v2188_v1 }
 0xcc9   :  { %v2187_v2 = vld [vmem:[#allocation26 + $0x10] sm:$0xff] }
 0xd35   :  { %v1847_v11 = vpop.permute.xlu0 %1846 }
 0xd36   :  { %v1857_v12 = vsel %vm1856_vm4, %v1854_v10, %v1847_v11 }
 0xd37   :  { %2683 = vmatprep.mubr.msk.f32.mxu1 %vm365_vm1, %v1857_v12 }
 0xd39   :  { %v1849_v15 = vpop.permute.xlu1 %1848 }
 0xd3a   :  { %v1858_v16 = vsel %vm1856_vm4, %v1855_v14, %v1849_v15  ;;  %v2282_v14 = vld [vmem:[%s3610_s17 + $0x18] sm:$0xff]  ;;  %v2281_v15 = vld [vmem:[%s3610_s17 + $0x10] sm:$0xff] }
 0xd3b   :  { %2684 = vmatmul.mubr.msk.f32.vlgmr.msra.gmra.mxu1 %vm365_vm1, %v1858_v16  ;;  %v2280_v16 = vld [vmem:[%s3610_s17 + $0x8] sm:$0xff] }
 0xd3c   :  { %2698 = vmatpush3.msra.mxu1 %v2094_v55 }
 0xd3d   :  { %2699 = vmatprep.subr.mxu1 %v2093_v56 }
 0xd3e   :  { %2700 = vmatpush3.msra.mxu1 %v2093_v56 }
 0xd3f   :  { %2701 = vmatprep.subr.mxu1 %v2092_v57 }
 0xd40   :  { %2702 = vmatpush3.msra.mxu1 %v2092_v57 }
 0xd41   :  { %2703 = vmatprep.subr.mxu1 %v2091_v58 }
 0xd42   :  { %2704 = vmatpush3.msra.mxu1 %v2091_v58 }
 0xd43   :  { %2719 = vmatprep.subr.mxu1 %v2282_v14 }
 0xdfb   :  { %v2685_v19 = vpop.f32.mrf.mxu1 }
 0xdfc   :  { %v1948_v21 = vadd.f32 %v2685_v19, %v2484_v17  ;;  %v2495_v19 = vld [vmem:[#allocation27] ss:$0 sm:$0xff] }
 0xdfd   :  { %v1942_v18 = vpop.f32.mrf.mxu1 }
 0xdfe   :  { %v3547_v22 = vadd.f32 %v1948_v21, %v3398_v9  ;;  %v1943_v23 = vadd.f32 %v2484_v17, %v1942_v18  ;;  %v2279_v17 = vld [vmem:[%s3610_s17] sm:$0xff] }
 0xe00   :  { %v3550_v24 = vadd.f32 %v1943_v23, %v3396_v8  ;;  %v1958_v20 = vsel %vm365_vm1, %v3547_v22, 0.0 }
 0xe01   :  { %1959 = vadd.xlane.f32.xlu1 %v1958_v20 }
 0xe02   :  { %v1955_v25 = vsel %vm365_vm1, %v3550_v24, 0.0 }
 0xe03   :  { %1956 = vadd.xlane.f32.xlu0 %v1955_v25  ;;  %v3207_v25 = vmov 0  }
 0xe04   :  { %2765 = vset.pattern.permute.xlu0 %v3207_v25 }
 0xe8a   :  { %v1960_v26 = vpop.xlane.xlu1 %1959 }
 0xe8b   :  { %v1962_v27 = vmul.f32 0.03125, %v1960_v26  ;;  %v2498_v26 = vld [vmem:[%s3611_s18] ss:$0 sm:$0xff]  ;;  %s3208_s18 = smov [#allocation29]  }
 0xe8c   :  { %v1957_v28 = vpop.xlane.xlu0 %1956 }
 0xe8d   :  { %v1961_v29 = vmul.f32 0.03125, %v1957_v28  ;;  %v1964_v30 = vsub.f32 %v3547_v22, %v1962_v27 }
 0xe8f   :  { %v1963_v9 = vsub.f32 %v3550_v24, %v1961_v29  ;;  %v1966_v32 = vmul.f32 %v1964_v30, %v1964_v30 }
 0xe91   :  { %v1965_v31 = vmul.f32 %v1963_v9, %v1963_v9  ;;  %v1970_v33 = vsel %vm365_vm1, %v1966_v32, 0.0 }
 0xe93   :  { %v1967_v8 = vsel %vm365_vm1, %v1965_v31, 0.0 }
 0xe94   :  { %1968 = vadd.xlane.f32.xlu0 %v1967_v8 }
 0xe98   :  { %1971 = vadd.xlane.f32.xlu0 %v1970_v33 }
 0xf1d   :  { %v1969_v38 = vpop.xlane.xlu0 %1968 }
 0xf1e   :  { %v1973_v39 = vmul.f32 0.03125, %v1969_v38 }
 0xf20   :  { %v1975_v40 = vadd.f32 1e-05, %v1973_v39 }
 0xf21   :  { %v1972_v42 = vpop.xlane.xlu0 %1971 }
 0xf22   :  { %2802 = vrsqrt.f32 %v1975_v40  ;;  %v1974_v41 = vmul.f32 0.03125, %v1972_v42 }
 0xf24   :  { %v1976_v43 = vadd.f32 1e-05, %v1974_v41 }
 0xf26   :  { %2804 = vrsqrt.f32 %v1976_v43 }
 0xf2f   :  { %v2803_v44 = vpop.eup %2802 }
 0xf30   :  { %v1979_v48 = vmul.f32 %v2803_v44, %v1963_v9 }
 0xf32   :  { %v1987_v50 = vmul.f32 %v2487_v46, %v1979_v48 }
 0xf33   :  { %v2805_v45 = vpop.eup %2804 }
 0xf34   :  { %v1980_v51 = vmul.f32 %v2805_v45, %v1964_v30  ;;  %v1995_v52 = vadd.f32 %v2488_v49, %v1987_v50  ;;  %v2501_v30 = vld [vmem:[%s3612_s19] ss:$0 sm:$0xff]  ;;  %v2414_v50 = vlaneseq  ;;  %s2435_s19 = sshll.u32 %s3208_s18, 4  ;;  %s2436_s19 = int_to_ptr.vmem [resolvable:$true] %s2435_s19 }
 0xf35   :  { %s3134_s15 = scalar_lea.vmem %s2436_s19, 32  ;;  %p3139_p11 = scmp.lt.s32.totalorder %s2436_s19, %s2436_s19 }
 0xf36   :  { %v1988_v53 = vmul.f32 %v2487_v46, %v1980_v51  ;;  %2694 = vmatprep.mubr.msk.f32.mxu0 %vm365_vm1, %v1995_v52  ;;  %v2415_v45 = vand.u32 127, %v2414_v50  ;;  %v2417_v51 = vshrl.u32 %v2414_v50, 7  ;;  %p3135_p10 = scmp.ne.s32.totalorder %s2436_s19, %s3134_s15  ;;  %p3140_p12 = scmp.lt.s32.totalorder %s3134_s15, %s3134_s15 }
 0xf38   :  { %v1996_v54 = vadd.f32 %v2488_v49, %v1988_v53  ;;  %v2418_v52 = vsub.s32 %v2415_v45, %v2417_v51  ;;  %p3141_p13 = por %p3140_p12, %p3139_p11 }
 0xf3a   :  { %2695 = vmatmul.mubr.msk.f32.vlgmr.msra.gmra.mxu0 %vm365_vm1, %v1996_v54  ;;  %p3142_p0 = pnand %p3141_p13, %p3135_p10 }
 0xf3b   :  { %2709 = vmatpush3.msra.mxu0 %v2188_v1 }
 0xf3c   :  { %2710 = vmatprep.subr.mxu0 %v2187_v2 }
 0xf3d   :  { %2711 = vmatpush3.msra.mxu0 %v2187_v2 }
 0xf3e   :  { %2712 = vmatprep.subr.mxu0 %v2186_v3 }
 0xf3f   :  { %2713 = vmatpush3.msra.mxu0 %v2186_v3 }
 0xf40   :  { %2714 = vmatprep.subr.mxu0 %v2185_v4 }
 0xf41   :  { %2715 = vmatpush3.msra.mxu0 %v2185_v4 }
 0xffa   :  { %v2696_v60 = vpop.f32.mrf.mxu0 }
 0xffb   :  { %v2086_v61 = vadd.f32 %v2696_v60, %v2489_v59 }
 0xffc   :  { %v2080_v47 = vpop.f32.mrf.mxu0 }
 0xffd   :  { %v2081_v62 = vadd.f32 %v2489_v59, %v2080_v47  ;;  %v2090_v0 = vmax.f32 %v2086_v61, 0.0 }
 0xfff   :  { %v2089_v63 = vmax.f32 %v2081_v62, 0.0 }
0x1001   :  { %2705 = vmatprep.mubr.msk.f32.mxu1 %vm365_vm1, %v2089_v63 }
0x1002   :  { %2706 = vmatmul.mubr.msk.f32.vlgmr.msra.gmra.mxu1 %vm365_vm1, %v2090_v0 }
0x1003   :  { %2720 = vmatpush3.msra.mxu1 %v2282_v14 }
0x1004   :  { %2721 = vmatprep.subr.mxu1 %v2281_v15 }
0x1005   :  { %2722 = vmatpush3.msra.mxu1 %v2281_v15 }
0x1006   :  { %2723 = vmatprep.subr.mxu1 %v2280_v16 }
0x1007   :  { %2724 = vmatpush3.msra.mxu1 %v2280_v16 }
0x1008   :  { %2725 = vmatprep.subr.mxu1 %v2279_v17 }
0x1009   :  { %2726 = vmatpush3.msra.mxu1 %v2279_v17 }
0x10c2   :  { %v2707_v6 = vpop.f32.mrf.mxu1 }
0x10c3   :  { %v2180_v7 = vadd.f32 %v2707_v6, %v2492_v5 }
0x10c4   :  { %v2174_v10 = vpop.f32.mrf.mxu1 }
0x10c5   :  { %v2175_v11 = vadd.f32 %v2492_v5, %v2174_v10  ;;  %v2184_v13 = vadd.f32 %v2180_v7, %v3547_v22 }
0x10c7   :  { %v2183_v12 = vadd.f32 %v2175_v11, %v3550_v24 }
0x10c9   :  { %2716 = vmatprep.mubr.msk.f32.mxu0 %vm365_vm1, %v2183_v12 }
0x10ca   :  { %2717 = vmatmul.mubr.msk.f32.vlgmr.msra.gmra.mxu0 %vm365_vm1, %v2184_v13 }
0x118a   :  { %v2718_v21 = vpop.f32.mrf.mxu0 }
0x118b   :  { %v2274_v18 = vadd.f32 %v2718_v21, %v2495_v19 }
0x118c   :  { %v2268_v22 = vpop.f32.mrf.mxu0 }
0x118d   :  { %v2269_v23 = vadd.f32 %v2495_v19, %v2268_v22  ;;  %v2278_v20 = vmax.f32 %v2274_v18, 0.0 }
0x118f   :  { %v2277_v24 = vmax.f32 %v2269_v23, 0.0 }
0x1191   :  { %2727 = vmatprep.mubr.msk.f32.mxu1 %vm365_vm1, %v2277_v24 }
0x1192   :  { %2728 = vmatmul.mubr.msk.f32.vlgmr.msra.gmra.mxu1 %vm365_vm1, %v2278_v20 }
0x1252   :  { %v2729_v27 = vpop.f32.mrf.mxu1 }
0x1253   :  { %v2368_v28 = vadd.f32 %v2729_v27, %v2498_v26 }
0x1254   :  { %v2362_v29 = vpop.f32.mrf.mxu1 }
0x1255   :  { %v2372_v9 = vmax.f32 %v2368_v28, 0.0  ;;  %v2363_v31 = vadd.f32 %v2498_v26, %v2362_v29 }
0x1257   :  { %v2371_v8 = vmax.f32 %v2363_v31, 0.0  ;;  %v2381_v32 = vmul.f32 %v2501_v30, %v2372_v9 }
0x1259   :  { %v2385_v33 = vsel %vm365_vm1, %v2381_v32, 0.0  ;;  %v2380_v34 = vmul.f32 %v2501_v30, %v2371_v8 }
0x125a   :  { %2386 = vadd.xlane.f32.xlu1 %v2385_v33 }
0x125b   :  { %v2382_v35 = vsel %vm365_vm1, %v2380_v34, 0.0 }
0x125c   :  { %2383 = vadd.xlane.f32.xlu0 %v2382_v35 }
0x1272   :  { %2395 = vperm.xlu0 %2765, %v2502_v36  }
0x12e3   :  { %v2387_v38 = vpop.xlane.xlu1 %2386 }
0x12e5   :  { %v2384_v37 = vpop.xlane.xlu0 %2383 }
0x12ed   :  { %v2396_v39 = vpop.permute.xlu0 %2395 }
0x12ee   :  { %v2398_v40 = vadd.f32 %v2396_v39, %v2384_v37  ;;  %v2399_v42 = vadd.f32 %v2396_v39, %v2387_v38 }
0x12f0   :  { %v2503_v41 = vmul.f32 -1.442695, %v2398_v40  ;;  %v2504_v43 = vmul.f32 -1.442695, %v2399_v42 }
0x12f2   :  { %2806 = vpow2.f32 %v2503_v41 }
0x12f3   :  { %2808 = vpow2.f32 %v2504_v43 }
0x12ff   :  { %v2807_v44 = vpop.eup %2806 }
0x1300   :  { %v2809_v46 = vpop.eup %2808  ;;  %v2406_v48 = vadd.f32 1.0, %v2807_v44 }
0x1301   :  { %v2407_v49 = vadd.f32 1.0, %v2809_v46 }
0x1302   :  { %2810 = vrcp.f32 %v2406_v48 }
0x1303   :  { %2812 = vrcp.f32 %v2407_v49 }
0x130f   :  { %v2811_v53 = vpop.eup %2810 }
0x1310   :  { %v2813_v54 = vpop.eup %2812  ;;  %v2419_v55 = vrot.slane %v2811_v53, %v2418_v52 }
0x1311   :  { %v2423_v56 = vrot.slane %v2813_v54, %v2418_v52 }
0x1313   :  { %v2425_v57 = vsel %vm2424_vm5, %v2423_v56, %v2419_v55 }
0x1314   :  { %2428 = vst.msk [vmem:[#allocation29] sm:$0x3] %vm2427_vm6, %v2425_v57 }
0x1315   :  { %3145 = shalt.err (!%p3142_p0)
}
0x1316   :  { %2438 = dma.vmem_to_hbm [thread:$0]  %s2436_s19, 32, %s3614_s21, [#allocation5]  }
0x1317   :  { %3172 = dma.done.wait [#allocation5], 32  }
0x1318   :  { %3173 = vsyncadd [#allocation5], 4294967264 }
0x1319   :  { %2442 = vsyncpa [#allocation4], 1 }
0x131a   :  { %2443 = vsyncpa [#allocation7], 1 }
0x131b   :  { %2444 = vsyncpa [#allocation10], 1 }
0x131c   :  { %2445 = vsyncpa [#allocation13], 1 }
0x131d   :  { %2446 = vsyncpa [#allocation16], 1 }
0x131e   :  { %2447 = vsyncpa [#allocation19], 1 }
0x131f   :  { %2448 = vsyncpa [#allocation22], 1 }
0x1320   :  { %2449 = vsyncpa [#allocation25], 1 }
0x1321   :  { %2450 = vsyncpa [#allocation28], 1 }
0x1322   :  { %2451 = vsyncpa [#allocation5], 1 }

</bundles_post_ra>
